<compile_context>
chip_gen: v7x
topology: tpu7x:2x2x1
jax: 0.10.0
libtpu: 0.0.40
codegen_flags: <defaults>
</compile_context>

<pallas_src>
import jax
import jax.numpy as jnp
from jax.experimental import pallas as pl
from jax.experimental.pallas import tpu as pltpu


def _round_up(x, m):
    return ((x + m - 1) // m) * m


def _fit_tile(extent, want, align):
    """Largest multiple of `align` <= min(want, extent); full extent if tiny."""
    if extent < align:
        return extent
    return max(align, min(want, (extent // align) * align))


def _vmem_capacity_bytes():
    try:
        return int(pltpu.get_tpu_info().vmem_capacity_bytes)
    except Exception:
        return 64 << 20  # conservative: v7x per-TensorCore VMEM


def _pick_batch_tile(B, bm_max):
    bm = _fit_tile(B, bm_max, 8)
    # Megacore: v7x shards "parallel" grid axes over 2 TensorCores -- make sure
    # the batch axis has at least 2 tiles whenever the batch allows it.
    if pl.cdiv(B, bm) < 2 and bm >= 16:
        bm = _fit_tile(B, max(8, bm // 2), 8)
    return bm


def _divisors_desc(total, step, cap):
    """Multiples of `step` dividing `total`, descending, capped at `cap`."""
    out = []
    t = (min(cap, total) // step) * step
    while t >= step:
        if total % t == 0:
            out.append(t)
        t -= step
    return out or [total]


def _fwd_footprint(bm, D_in, th, tn, out_itemsize, n_h):
    """Per-step VMEM bytes (double-buffered blocks + live intermediates)."""
    f = (2 * bm * D_in * 4            # x blocks (f32, cast to bf16 in-kernel)
         + 2 * D_in * th * 2          # W1 (bf16)
         + 2 * th * 4                 # b1 (f32)
         + 2 * th * tn * 2            # W2 (bf16)
         + 2 * tn * 4                 # b2 (f32)
         + 2 * bm * tn * out_itemsize # output double-buffer
         + bm * th * 6)               # live relu intermediate (f32 + bf16 copy)
    if n_h > 1:
        f += bm * tn * 4              # f32 accumulator scratch
    return f


def _choose_tiles(B, D_in, H_p, D_out_p, out_itemsize, vmem_cap):
    big = vmem_cap >= (96 << 20)      # v5e/v6e: 128 MiB, v7x: 64 MiB
    bm_max = 512 if big else 256
    th_max = 1024 if big else 512
    bm = _pick_batch_tile(B, bm_max)
    headroom = 8 << 20                # Mosaic internal scratch + slack

    for tn in _divisors_desc(D_out_p, 128, D_out_p):       # prefer D_out untiled
        for th in _divisors_desc(H_p, 256, th_max):        # 256-mult fills MXU
            n_h = H_p // th
            if _fwd_footprint(bm, D_in, th, tn, out_itemsize, n_h) + headroom <= vmem_cap:
                return bm, th, tn
    # Fallback: smallest legal tiles.
    # TODO(synk): tile D_in (second reduction axis) for very wide inputs.
    return bm, _divisors_desc(H_p, 256, 256)[-1], _divisors_desc(D_out_p, 128, 128)[-1]


# ----------------------------------------------------------------------------
# Forward kernels: o = relu(x @ W1 + b1) @ W2 + b2
# ----------------------------------------------------------------------------
def _mlp_fwd_noacc_kernel(x_ref, w1_ref, b1_ref, w2_ref, b2_ref, o_ref):
    # x cast rides the VPU under the MXU (no out-of-kernel HBM pass).
    x = x_ref[...].astype(jnp.bfloat16)
    h = jnp.dot(x, w1_ref[...], preferred_element_type=jnp.float32)
    h = jnp.maximum(h + b1_ref[...], 0.0)
    o = jnp.dot(h.astype(w2_ref.dtype), w2_ref[...],
                preferred_element_type=jnp.float32)
    o_ref[...] = (o + b2_ref[...]).astype(o_ref.dtype)


def _mlp_fwd_acc_kernel(x_ref, w1_ref, b1_ref, w2_ref, b2_ref, o_ref, acc_ref):
    k = pl.program_id(2)

    @pl.when(k == 0)
    def _():
        acc_ref[...] = jnp.zeros_like(acc_ref)

    x = x_ref[...].astype(jnp.bfloat16)
    h = jnp.dot(x, w1_ref[...], preferred_element_type=jnp.float32)
    h = jnp.maximum(h + b1_ref[...], 0.0)        # relu is elementwise in H, so
    acc_ref[...] += jnp.dot(h.astype(w2_ref.dtype), w2_ref[...],   # sum over H
                            preferred_element_type=jnp.float32)    # tiles is OK

    @pl.when(k == pl.num_programs(2) - 1)
    def _():
        o_ref[...] = (acc_ref[...] + b2_ref[...]).astype(o_ref.dtype)


# ----------------------------------------------------------------------------
# One-time parameter prep (hoisted out of the per-step forward)
# ----------------------------------------------------------------------------
def prepare_parameters(w1, b1, w2, b2):
    """Pad + cast the static DDP parameters once (bf16 MXU operands, f32 bias)."""
    D_in, H = w1.shape
    D_out = w2.shape[1]
    H_p = _round_up(H, 256 if H > 128 else 128)   # 256-mult fills v6e/v7x MXU
    D_out_p = _round_up(D_out, 128)               # lane-dense output stores
    w1b = jnp.pad(w1, ((0, 0), (0, H_p - H))).astype(jnp.bfloat16)
    b1p = jnp.pad(b1.reshape(1, -1), ((0, 0), (0, H_p - H))).astype(jnp.float32)
    w2b = jnp.pad(w2, ((0, H_p - H), (0, D_out_p - D_out))).astype(jnp.bfloat16)
    b2p = jnp.pad(b2.reshape(1, -1), ((0, 0), (0, D_out_p - D_out))).astype(jnp.float32)
    return dict(w1=w1b, b1=b1p, w2=w2b, b2=b2p,
                D_in=D_in, H=H, D_out=D_out, H_p=H_p, D_out_p=D_out_p)


def ddp_forward(x, prepped, *, bm=None, th=None, tn=None):
    """Forward of DDP(module) == module.forward(x).  x: [B, D_in] -> [B, D_out]."""
    B, D_in = x.shape
    assert D_in == prepped["D_in"]
    w1b, b1p, w2b, b2p = prepped["w1"], prepped["b1"], prepped["w2"], prepped["b2"]
    H_p, D_out_p, D_out = prepped["H_p"], prepped["D_out_p"], prepped["D_out"]
    out_dtype = x.dtype
    out_itemsize = jnp.dtype(out_dtype).itemsize

    vmem_cap = _vmem_capacity_bytes()
    bm_a, th_a, tn_a = _choose_tiles(B, D_in, H_p, D_out_p, out_itemsize, vmem_cap)
    bm = bm or bm_a
    th = th or th_a
    tn = tn or tn_a
    assert H_p % th == 0 and D_out_p % tn == 0

    n_b = pl.cdiv(B, bm)
    n_n = D_out_p // tn
    n_h = H_p // th

    fp = _fwd_footprint(bm, D_in, th, tn, out_itemsize, n_h)
    vmem_limit = int(min(max(fp + (8 << 20), 32 << 20), vmem_cap - (4 << 20)))

    cost = pl.CostEstimate(
        flops=2 * B * D_in * H_p * n_n + 2 * B * H_p * D_out_p,
        transcendentals=0,
        bytes_accessed=int(B * D_in * jnp.dtype(x.dtype).itemsize * n_n
                           + (w1b.size * 2 + b1p.size * 4
                              + w2b.size * 2 + b2p.size * 4) * n_b
                           + B * D_out_p * out_itemsize))

    if n_h == 1:
        # Canonical case: no reduction axis, no accumulator round-trip.
        kernel = _mlp_fwd_noacc_kernel
        grid = (n_b, n_n)
        in_specs = [
            pl.BlockSpec((bm, D_in), lambda i, j: (i, 0)),
            pl.BlockSpec((D_in, H_p), lambda i, j: (0, 0)),
            pl.BlockSpec((1, H_p), lambda i, j: (0, 0)),
            pl.BlockSpec((H_p, tn), lambda i, j: (0, j)),
            pl.BlockSpec((1, tn), lambda i, j: (0, j)),
        ]
        out_specs = pl.BlockSpec((bm, tn), lambda i, j: (i, j))
        scratch = []
        dimsem = ("parallel", "parallel")
    else:
        kernel = _mlp_fwd_acc_kernel
        grid = (n_b, n_n, n_h)                       # reduction axis last
        in_specs = [
            pl.BlockSpec((bm, D_in), lambda i, j, k: (i, 0)),
            pl.BlockSpec((D_in, th), lambda i, j, k: (0, k)),
            pl.BlockSpec((1, th), lambda i, j, k: (0, k)),
            pl.BlockSpec((th, tn), lambda i, j, k: (k, j)),
            pl.BlockSpec((1, tn), lambda i, j, k: (0, j)),
        ]
        out_specs = pl.BlockSpec((bm, tn), lambda i, j, k: (i, j))
        scratch = [pltpu.VMEM((bm, tn), jnp.float32)]
        dimsem = ("parallel", "parallel", "arbitrary")

    out = pl.pallas_call(
        kernel,
        out_shape=jax.ShapeDtypeStruct((B, D_out_p), out_dtype),
        grid_spec=pltpu.PrefetchScalarGridSpec(
            num_scalar_prefetch=0, grid=grid,
            in_specs=in_specs, out_specs=out_specs, scratch_shapes=scratch),
        compiler_params=pltpu.CompilerParams(
            dimension_semantics=dimsem, vmem_limit_bytes=vmem_limit),
        cost_estimate=cost,
    )(x, w1b, b1p, w2b, b2p)

    if D_out_p != D_out:
        out = out[:, :D_out]
    return out


# ----------------------------------------------------------------------------
# Gradient synchronization: all_reduce(SUM) / world_size
# (single-host simulation: per-replica grads stacked along a leading world axis)
# ----------------------------------------------------------------------------
def _allreduce_mean_kernel(g_ref, o_ref):
    world = g_ref.shape[0]
    s = jnp.sum(g_ref[...].astype(jnp.float32), axis=0)
    o_ref[...] = (s * (1.0 / world)).astype(o_ref.dtype)


def finish_gradient_synchronization(stacked_grad, *, tr=None, tc=None):
    """stacked_grad: [world_size, R, C] -> mean over world.  Pure HBM streaming;
    no padding copies -- Pallas masks the ragged edge blocks."""
    W, R, C = stacked_grad.shape
    itemsize = jnp.dtype(stacked_grad.dtype).itemsize
    vmem_cap = _vmem_capacity_bytes()
    big = vmem_cap >= (96 << 20)

    tc = tc if tc is not None else (2048 if big else 1024)
    tr = tr if tr is not None else (512 if big else 256)
    tc = _fit_tile(C, tc, 128)
    tr = _fit_tile(R, tr, 8)

    # Keep the (double-buffered [W, tr, tc] input + output) working set at
    # roughly a third of VMEM so the auto-pipeline never spills.
    per_row = (2 * W + 2) * tc * itemsize
    if R >= 8:
        budget = max(vmem_cap // 3, 8 << 20)
        tr = max(8, min(tr, (budget // per_row) // 8 * 8))

    fp = per_row * tr
    vmem_limit = int(min(max(fp + (8 << 20), 16 << 20), vmem_cap - (4 << 20)))

    cost = pl.CostEstimate(
        flops=W * R * C, transcendentals=0,
        bytes_accessed=(W + 1) * R * C * itemsize)

    return pl.pallas_call(
        _allreduce_mean_kernel,
        out_shape=jax.ShapeDtypeStruct((R, C), stacked_grad.dtype),
        grid_spec=pltpu.PrefetchScalarGridSpec(
            num_scalar_prefetch=0,
            grid=(pl.cdiv(R, tr), pl.cdiv(C, tc)),
            in_specs=[pl.BlockSpec((W, tr, tc), lambda i, j: (0, i, j))],
            out_specs=pl.BlockSpec((tr, tc), lambda i, j: (i, j))),
        compiler_params=pltpu.CompilerParams(
            dimension_semantics=("parallel", "parallel"),
            vmem_limit_bytes=vmem_limit),
        cost_estimate=cost,
    )(stacked_grad)


# ----------------------------------------------------------------------------
# Parameter broadcast (src=0): single-host simulation = select rank-0 replica.
# ----------------------------------------------------------------------------
def broadcast_parameters(per_rank_params):
    # TODO(synk): a true multi-chip broadcast would use
    # pltpu.make_async_remote_copy from device 0 + barrier semaphores
    # (collective_id); single-host it reduces to picking src=0.
    return [p[0] for p in per_rank_params]


# ----------------------------------------------------------------------------
# Pure-JAX reference (mirrors bf16 operand rounding / f32 accumulation)
# ----------------------------------------------------------------------------
def _ref_forward(x, w1, b1, w2, b2):
    xb = x.astype(jnp.bfloat16).astype(jnp.float32)
    w1b = w1.astype(jnp.bfloat16).astype(jnp.float32)
    w2b = w2.astype(jnp.bfloat16).astype(jnp.float32)
    h = jnp.maximum(xb @ w1b + b1, 0.0)
    h = h.astype(jnp.bfloat16).astype(jnp.float32)
    return h @ w2b + b2


if __name__ == "__main__":
    key = jax.random.PRNGKey(0)
    B, D_in, H, D_out = 512, 128, 512, 192     # D_out=192 exercises lane padding
    WORLD = 4

    k = jax.random.split(key, 6)
    x = jax.random.normal(k[0], (B, D_in), dtype=jnp.float32)

    # Per-rank parameter replicas (only rank 0's copy matters after broadcast).
    w1_ranks = jax.random.normal(k[1], (WORLD, D_in, H), jnp.float32) * 0.1
    b1_ranks = jax.random.normal(k[2], (WORLD, 1, H), jnp.float32) * 0.1
    w2_ranks = jax.random.normal(k[3], (WORLD, H, D_out), jnp.float32) * 0.1
    b2_ranks = jax.random.normal(k[4], (WORLD, 1, D_out), jnp.float32) * 0.1

    # DDP.__init__: broadcast from src=0, then pad/cast the static params ONCE.
    w1, b1, w2, b2 = broadcast_parameters([w1_ranks, b1_ranks, w2_ranks, b2_ranks])
    prepped = prepare_parameters(w1, b1, w2, b2)

    ref = _ref_forward(x, w1, b1, w2, b2)

    # DDP.forward == wrapped module forward (fused Pallas kernel), auto tiles.
    out = jax.block_until_ready(ddp_forward(x, prepped))
    assert out.shape == (B, D_out)
    assert jnp.allclose(out, ref, atol=2e-2, rtol=2e-2), float(
        jnp.max(jnp.abs(out - ref)))

    # Force the hidden-reduction path (2 H tiles -> f32 VMEM accumulator).
    out2 = jax.block_until_ready(ddp_forward(x, prepped, th=256))
    assert jnp.allclose(out2, ref, atol=2e-2, rtol=2e-2), float(
        jnp.max(jnp.abs(out2 - ref)))

    # finish_gradient_synchronization: all_reduce(SUM)/world_size on fake grads
    # (misaligned shape exercises the ragged-edge, copy-free path).
    fake_grads = jax.random.normal(k[5], (WORLD, 300, 640), jnp.float32)
    synced = jax.block_until_ready(finish_gradient_synchronization(fake_grads))
    ref_sync = jnp.sum(fake_grads, axis=0) / WORLD
    assert synced.shape == ref_sync.shape
    assert jnp.allclose(synced, ref_sync, atol=1e-5, rtol=1e-5)

    print("KERNEL_OK")
</pallas_src>

<mosaic_0001>
module attributes {stable_mosaic.version = 11 : i64} {
  func.func @_mlp_fwd_noacc_kernel(%arg0: i32, %arg1: i32, %arg2: memref<256x128xf32, #tpu.memory_space<vmem>>, %arg3: memref<128x512xbf16, #tpu.memory_space<vmem>>, %arg4: memref<1x512xf32, #tpu.memory_space<vmem>>, %arg5: memref<512x256xbf16, #tpu.memory_space<vmem>>, %arg6: memref<1x256xf32, #tpu.memory_space<vmem>>, %arg7: memref<256x256xf32, #tpu.memory_space<vmem>>) attributes {dimension_semantics = [#tpu.dimension_semantics<parallel>, #tpu.dimension_semantics<parallel>], iteration_bounds = array<i64: 2, 1>, scalar_prefetch = 0 : i64, scratch_operands = 0 : i64, tpu.core_type = #tpu.core_type<tc>, window_params = [{transform_indices = @transform_0, window_bounds = array<i64: 256, 128>}, {pipeline_mode = #tpu.pipeline_mode<synchronous>, transform_indices = @transform_1, window_bounds = array<i64: 128, 512>}, {pipeline_mode = #tpu.pipeline_mode<synchronous>, transform_indices = @transform_2, window_bounds = array<i64: 1, 512>}, {transform_indices = @transform_3, window_bounds = array<i64: 512, 256>}, {transform_indices = @transform_4, window_bounds = array<i64: 1, 256>}, {transform_indices = @transform_5, window_bounds = array<i64: 256, 256>}]} {
    %c0 = arith.constant 0 : index
    %c0_0 = arith.constant 0 : index
    %0 = vector.load %arg2[%c0, %c0_0] : memref<256x128xf32, #tpu.memory_space<vmem>>, vector<256x128xf32>
    %1 = arith.truncf %0 : vector<256x128xf32> to vector<256x128xbf16>
    %c0_1 = arith.constant 0 : index
    %c0_2 = arith.constant 0 : index
    %2 = vector.load %arg3[%c0_1, %c0_2] : memref<128x512xbf16, #tpu.memory_space<vmem>>, vector<128x512xbf16>
    %cst = arith.constant dense<0.000000e+00> : vector<256x512xf32>
    %3 = tpu.matmul %1, %2, %cst {dimension_numbers = #tpu.dot_dimension_numbers<[1], [0], [0], [1], [0, 0, 1, 1], [], []>} : vector<256x128xbf16>, vector<128x512xbf16>, vector<256x512xf32> -> vector<256x512xf32>
    %c0_3 = arith.constant 0 : index
    %c0_4 = arith.constant 0 : index
    %4 = vector.load %arg4[%c0_3, %c0_4] : memref<1x512xf32, #tpu.memory_space<vmem>>, vector<1x512xf32>
    %5 = vector.broadcast %4 : vector<1x512xf32> to vector<256x512xf32>
    %6 = arith.addf %3, %5 : vector<256x512xf32>
    %cst_5 = arith.constant 0.000000e+00 : f32
    %7 = vector.broadcast %cst_5 : f32 to vector<256x512xf32>
    %8 = arith.maximumf %6, %7 : vector<256x512xf32>
    %9 = arith.truncf %8 : vector<256x512xf32> to vector<256x512xbf16>
    %c0_6 = arith.constant 0 : index
    %c0_7 = arith.constant 0 : index
    %10 = vector.load %arg5[%c0_6, %c0_7] : memref<512x256xbf16, #tpu.memory_space<vmem>>, vector<512x256xbf16>
    %cst_8 = arith.constant dense<0.000000e+00> : vector<256x256xf32>
    %11 = tpu.matmul %9, %10, %cst_8 {dimension_numbers = #tpu.dot_dimension_numbers<[1], [0], [0], [1], [0, 0, 1, 1], [], []>} : vector<256x512xbf16>, vector<512x256xbf16>, vector<256x256xf32> -> vector<256x256xf32>
    %c0_9 = arith.constant 0 : index
    %c0_10 = arith.constant 0 : index
    %12 = vector.load %arg6[%c0_9, %c0_10] : memref<1x256xf32, #tpu.memory_space<vmem>>, vector<1x256xf32>
    %13 = vector.broadcast %12 : vector<1x256xf32> to vector<256x256xf32>
    %14 = arith.addf %11, %13 : vector<256x256xf32>
    %c0_11 = arith.constant 0 : index
    %c0_12 = arith.constant 0 : index
    %15 = vector.load %arg7[%c0_11, %c0_12] : memref<256x256xf32, #tpu.memory_space<vmem>>, vector<256x256xf32>
    tpu.vector_store %arg7[%c0_11, %c0_12], %14 {strides = array<i32>} : memref<256x256xf32, #tpu.memory_space<vmem>>, vector<256x256xf32>,
    return
  }
  func.func @transform_0(%arg0: i32, %arg1: i32) -> (i32, i32) {
    %c0_i32 = arith.constant 0 : i32
    %c0_i32_0 = arith.constant 0 : i32
    return %arg0, %c0_i32 : i32, i32
  }
  func.func @transform_1(%arg0: i32, %arg1: i32) -> (i32, i32) {
    %c0_i32 = arith.constant 0 : i32
    %c0_i32_0 = arith.constant 0 : i32
    %c0_i32_1 = arith.constant 0 : i32
    return %c0_i32, %c0_i32_0 : i32, i32
  }
  func.func @transform_2(%arg0: i32, %arg1: i32) -> (i32, i32) {
    %c0_i32 = arith.constant 0 : i32
    %c0_i32_0 = arith.constant 0 : i32
    %c0_i32_1 = arith.constant 0 : i32
    return %c0_i32, %c0_i32_0 : i32, i32
  }
  func.func @transform_3(%arg0: i32, %arg1: i32) -> (i32, i32) {
    %c0_i32 = arith.constant 0 : i32
    %c0_i32_0 = arith.constant 0 : i32
    return %c0_i32, %arg1 : i32, i32
  }
  func.func @transform_4(%arg0: i32, %arg1: i32) -> (i32, i32) {
    %c0_i32 = arith.constant 0 : i32
    %c0_i32_0 = arith.constant 0 : i32
    return %c0_i32, %arg1 : i32, i32
  }
  func.func @transform_5(%arg0: i32, %arg1: i32) -> (i32, i32) {
    %c0_i32 = arith.constant 0 : i32
    return %arg0, %arg1 : i32, i32
  }
}

</mosaic_0001>

<bundles_post_ra>
// kernel: tpu_custom_call.1
= control target key start
LH: loop header
LB: loop body
LE: loop exit
PB: predicated region body
PF: predicated region fallthrough
CT: control target
= control target key end

     0   :  { %10 = vsyncpa [#allocation3], 0  ;;  %s3454_s0 = inlined_call_operand.hbm [shape: f32[512,128], index: 0, kind: input, shape index: {}]   ;;  %s3455_s1 = inlined_call_operand.hbm [shape: bf16[128,512], index: 1, kind: input, shape index: {}]   ;;  %s3456_s2 = inlined_call_operand.vmem [shape: f32[1,512], index: 2, kind: input, shape index: {}]   ;;  %s3457_s3 = inlined_call_operand.hbm [shape: bf16[512,256], index: 3, kind: input, shape index: {}]   ;;  %s3458_s4 = inlined_call_operand.vmem [shape: f32[1,256], index: 4, kind: input, shape index: {}]   ;;  %s3459_s5 = inlined_call_operand.hbm [shape: f32[512,256], index: 5, kind: output, shape index: {}]  }
   0x1   :  { %12 = vsyncpa [#allocation3 + $0x1], 0 }
   0x2   :  { %13 = vsyncpa [#allocation6], 0 }
   0x3   :  { %14 = vsyncpa [#allocation4], 0 }
   0x4   :  { %16 = vsyncpa [#allocation4 + $0x1], 0  ;;  %s2835_s18 = smov 0   ;;  %s2837_s19 = smov 0  }
   0x5   :  { %s2839_s20 = smov 0   ;;  %s2841_s21 = smov 0  }
   0x6   :  { %s2843_s22 = smov 0   ;;  %s2845_s23 = smov 0  }
   0x7 LB: > { %s2138_s24 = sadd.s32 4294967295, %s2792_s23   ;;  %s2139_s25 = sadd.s32 4294967294, %s2792_s23   ;;  %s2792_s23 = sphi %s2845_s23, %s22_s23   ;;  %s2788_s22 = sphi %s2843_s22, %s3483_s22   ;;  %s2784_s21 = sphi %s2841_s21, %s3482_s21   ;;  %s2780_s20 = sphi %s2839_s20, %s3481_s20   ;;  %s2776_s19 = sphi %s2837_s19, %s3480_s19   ;;  %s2772_s18 = sphi %s2835_s18, %s3479_s18  }
   0x8   : > { %p54_p0 = scmp.ne.s32.totalorder %s2776_s19, %s2772_s18  ;;  %p2869_p1 = scmp.eq.s32.totalorder %s2138_s24, 0 }
   0x9   : > { %p2873_p2 = scmp.eq.s32.totalorder %s2138_s24, 1  ;;  %p180_p3 = scmp.eq.s32.totalorder %s2139_s25, 1 }
   0xa   : > { %s3465_s26 = scalar_select %p2869_p1, 1, 0 }
   0xb   : > { %p2879_p4 = por %p2869_p1, %p54_p0  ;;  %p2140_p5 = scmp.ge.s32.totalorder %s2792_s23, 1 }
   0xc   : > { %p2884_p6 = por %p180_p3, %p54_p0  ;;  %p187_p7 = scmp.lt.s32.totalorder %s2792_s23, 3 }
   0xd   : > { %s3467_s28 = scalar_select %p2879_p4, 1, 0 }
   0xe   : > { %s3468_s29 = scalar_select %p2884_p6, 1, 0 }
   0xf   : > { %p2889_p8 = pnand %p2140_p5, %p187_p7  ;;  %s2794_s6 = smov [#allocation5]  }
  0x10   : > { %s199_s7 = sshll.u32 %s2794_s6, 4  ;;  %s2795_s9 = smov [#allocation7]   ;;  %s2893_s7 = int_to_ptr.vmem [resolvable:$true] %s199_s7 }
  0x11   : > { %p2398_p9 = pneg %p2889_p8  ;;  %s218_s10 = sshll.u32 %s2795_s9, 4  ;;  %s2904_s10 = int_to_ptr.vmem [resolvable:$true] %s218_s10 }
  0x12   : > { %s2620_s13 = scalar_lea.hbm %s3455_s1, 4096 }
  0x13   : > { %p2900_p11 = pnand %p2398_p9, %p2869_p1  ;;  %p2621_p12 = scmp.ne.s32.totalorder %s3455_s1, %s2620_s13 }
  0x14   : > { %p2627_p5 = scmp.lt.u32.totalorder %s2620_s13, %s3455_s1 }
  0x15   : > { %p2622_p13 = pneg %p2900_p11 }
  0x17   : > { %p2623_p0 = pnand %p2622_p13, %p2621_p12 }
  0x19   : > { %p2624_p3 = pneg %p2623_p0 }
  0x1b   : > { %p2629_p7 = pnand %p2627_p5, %p2624_p3 }
  0x1d   : > { %2632 = shalt.err (!%p2629_p7)
}
  0x1e   : > { %s2633_s24 = scalar_lea.vmem %s2893_s7, 4096  ;;  %p2641_p1 = scmp.lt.s32.totalorder %s2893_s7, %s2893_s7 }
  0x1f   : > { %p2634_p9 = scmp.ne.s32.totalorder %s2893_s7, %s2633_s24  ;;  %p2642_p12 = scmp.lt.s32.totalorder %s2633_s24, %s2633_s24 }
  0x21   : > { %p2636_p10 = pnand %p2634_p9, %p2622_p13  ;;  %p2643_p0 = por %p2642_p12, %p2641_p1 }
  0x23   : > { %p2637_p6 = pneg %p2636_p10 }
  0x25   : > { %p2644_p4 = pnand %p2643_p0, %p2637_p6 }
  0x27   : > { %2647 = shalt.err (!%p2644_p4)
}
  0x28   : > { %s2796_s25 = smov 256   ;;  %s2797_s6 = smov 16  }
  0x29   : > { %2401 = dma.hbm_to_vmem [thread:$0]  (!%p2900_p11), %s3455_s1, 4096, %s2893_s7, [#allocation6], %s2796_s25, %s2796_s25, %s2797_s6  }
  0x2a   : > { %s2648_s14 = scalar_lea.hbm %s3457_s3, 8192 }
  0x2b   : > { %p2649_p1 = scmp.ne.s32.totalorder %s3457_s3, %s2648_s14  ;;  %p2655_p10 = scmp.lt.u32.totalorder %s2648_s14, %s3457_s3 }
  0x2d   : > { %p2651_p4 = pnand %p2649_p1, %p2622_p13 }
  0x2f   : > { %p2652_p6 = pneg %p2651_p4 }
  0x31   : > { %p2657_p3 = pnand %p2655_p10, %p2652_p6 }
  0x33   : > { %2660 = shalt.err (!%p2657_p3)
}
  0x34   : > { %s2661_s7 = scalar_lea.vmem %s2904_s10, 8192  ;;  %p2669_p12 = scmp.lt.s32.totalorder %s2904_s10, %s2904_s10 }
  0x35   : > { %p2662_p5 = scmp.ne.s32.totalorder %s2904_s10, %s2661_s7  ;;  %p2670_p0 = scmp.lt.s32.totalorder %s2661_s7, %s2661_s7 }
  0x37   : > { %p2664_p7 = pnand %p2662_p5, %p2622_p13  ;;  %p2671_p1 = por %p2670_p0, %p2669_p12 }
  0x39   : > { %p2665_p9 = pneg %p2664_p7 }
  0x3b   : > { %p2672_p4 = pnand %p2671_p1, %p2665_p9 }
  0x3d   : > { %2675 = shalt.err (!%p2672_p4)
}
  0x3e   : > { %s3463_s25 = smov 128   ;;  %s2799_s6 = smov 8  }
  0x3f   : > { %2404 = dma.hbm_to_vmem [thread:$0]  (!%p2900_p11), %s3457_s3, 8192, %s2904_s10, [#allocation6], %s3463_s25, %s3463_s25, %s2799_s6  }
  0x40   : > { %s34_s12 = sadd.s32 1, %s2788_s22  ;;  %s41_s13 = sadd.s32 1, %s2780_s20 }
  0x41   : > { %p36_p13 = scmp.ge.s32.totalorder %s34_s12, 2  ;;  %p48_p6 = scmp.ne.s32.totalorder %s2780_s20, %s2776_s19 }
  0x42   : > { %p49_p10 = scmp.eq.s32.totalorder %s2792_s23, 0  ;;  %p2415_p3 = scmp.lt.s32.totalorder %s2792_s23, 2 }
  0x43   : > { %s3485_s12 = smov (%p36_p13, %s34_s12), 0  ;;  %p2971_p7 = por %p2873_p2, %p48_p6 }
  0x44   : > { %p50_p5 = por %p49_p10, %p48_p6  ;;  %s38_s14 = ssub.s32 %s2788_s22, %s3485_s12 }
  0x45   : > { %s3471_s8 = scalar_select %p2971_p7, 1, 0 }
  0x46   : > { %s240_s15 = sand.u32 1, %s2780_s20   ;;  %p39_p9 = scmp.eq.s32.totalorder %s38_s14, 0 }
  0x47   : > { %s2145_s10 = sshll.u32 %s240_s15, 8  ;;  %s2255_s16 = sshll.u32 %s2788_s22, 12 }
  0x48   : > { %s2980_s17 = scalar_select %p39_p9, %s2780_s20, %s41_s13  }
  0x49   : > { %s2985_s9 = scalar_lea.hbm %s3454_s0, %s2255_s16  ;;  %s244_s27 = scalar_lea.vmem [#allocation2], %s2145_s10 }
  0x4a   : > { %s251_s11 = sshll.u32 %s244_s27, 4  ;;  %p2989_p2 = pnand %p2415_p3, %p50_p5  ;;  %s2993_s11 = int_to_ptr.vmem [resolvable:$true] %s251_s11 }
  0x4b   : > { %s2995_s13 = scalar_lea.sflag [#allocation3], %s240_s15  ;;  %s2676_s14 = scalar_lea.hbm %s2985_s9, 4096 }
  0x4c   : > { %p2677_p11 = scmp.ne.s32.totalorder %s2985_s9, %s2676_s14  ;;  %p2678_p12 = pneg %p2989_p2 }
  0x4d   : > { %s2681_s24 = scalar_lea.hbm %s3454_s0, 8192  ;;  %p2682_p4 = scmp.lt.u32.totalorder %s2985_s9, %s3454_s0 }
  0x4e   : > { %p2679_p0 = pnand %p2678_p12, %p2677_p11  ;;  %p2683_p13 = scmp.lt.u32.totalorder %s2681_s24, %s2676_s14 }
  0x4f   : > { %p2685_p10 = scmp.lt.u32.totalorder %s2676_s14, %s2985_s9 }
  0x50   : > { %p2680_p1 = pneg %p2679_p0  ;;  %p2684_p6 = por %p2683_p13, %p2682_p4 }
  0x52   : > { %p2686_p3 = por %p2685_p10, %p2684_p6 }
  0x54   : > { %p2687_p5 = pnand %p2686_p3, %p2680_p1 }
  0x56   : > { %2690 = shalt.err (!%p2687_p5)
}
  0x57   : > { %s2691_s15 = scalar_lea.vmem %s2993_s11, 4096  ;;  %s2800_s10 = smov [#allocation2]  }
  0x58   : > { %p2692_p9 = scmp.ne.s32.totalorder %s2993_s11, %s2691_s15  ;;  %s2696_s16 = sshll.u32 %s2800_s10, 4  ;;  %s2697_s16 = int_to_ptr.vmem [resolvable:$false] %s2696_s16 }
  0x59   : > { %s2698_s7 = scalar_lea.vmem %s2697_s16, 8192  ;;  %p2699_p7 = scmp.lt.s32.totalorder %s2993_s11, %s2697_s16 }
  0x5a   : > { %p2694_p11 = pnand %p2692_p9, %p2678_p12  ;;  %p2700_p4 = scmp.lt.s32.totalorder %s2698_s7, %s2691_s15 }
  0x5c   : > { %p2695_p0 = pneg %p2694_p11  ;;  %p2701_p13 = por %p2700_p4, %p2699_p7 }
  0x5e   : > { %p2702_p6 = pnand %p2701_p13, %p2695_p0 }
  0x60   : > { %2705 = shalt.err (!%p2702_p6)
}
  0x61   : > { %s3473_s14 = smov 128   ;;  %263 = sbr.rel (%p2889_p8) target bundleno = 718 (0x2ce), region = 40 }
  0x62   : > { %2408 = dma.hbm_to_vmem [thread:$0]  (!%p2989_p2), %s2985_s9, 4096, %s2993_s11, %s2995_s13, %s3473_s14, %s3473_s14, %s2799_s6  }
  0x63   : > { %s3029_s24 = sand.u32 (!%p2889_p8), 1, %s2776_s19   ;;  %p3474_p7 = scmp.ne.s32.totalorder (!%p2889_p8), %s3467_s28, 0 }
  0x64   : > { %s2149_s27 = sshll.u32 (!%p2889_p8), %s3029_s24, 8  ;;  %s266_s15 = scalar_lea.sflag (!%p2889_p8), [#allocation3], %s3029_s24 }
  0x65   : > { %s3033_s10 = scalar_lea.vmem (!%p2889_p8), [#allocation2], %s2149_s27 }
  0x68   : > { %2759 = dma.done.wait (%p3474_p7), %s266_s15, 4096  }
  0x69   : > { %2761 = vsyncadd (%p3474_p7), %s266_s15, 4294963200  ;;  %p3475_p2 = scmp.ne.s32.totalorder %s3465_s26, 0 }
  0x6b   : > { %2763 = dma.done.wait (%p3475_p2), [#allocation6], 12288  }
  0x6c   : > { %2765 = vsyncadd (%p3475_p2), [#allocation6], 4294955008  ;;  %v2801_v0 = vmov 0   ;;  %v2476_v1 = vld [vmem:[#allocation5 + $0x4] ss:$16 sps:$4 sm:$0xff]   ;;  %v319_v34 = vld [vmem:[%s3033_s10 + $0x8] sm:$0xff] }
  0x6d   : > { %612 = vmatprep.mubr.bf16.mxu0 %v2801_v0  ;;  %805 = vmatprep.mubr.bf16.mxu1 %v2801_v0  ;;  %v2478_v2 = vld [vmem:[#allocation5 + $0xc] ss:$16 sps:$4 sm:$0xff]   ;;  %v2480_v3 = vld [vmem:[#allocation5] ss:$16 sps:$4 sm:$0xff]   ;;  %v2481_v4 = vld [vmem:[#allocation5 + $0x8] ss:$16 sps:$4 sm:$0xff]  }
  0x6e   : > { %580 = vmatprep.subr.bf16.mxu0 %v2476_v1  ;;  %773 = vmatprep.subr.bf16.mxu1 %v2478_v2  ;;  %v2482_v5 = vld [vmem:[#allocation5 + $0x24] ss:$16 sps:$4 sm:$0xff]   ;;  %v2484_v6 = vld [vmem:[#allocation5 + $0x2c] ss:$16 sps:$4 sm:$0xff]   ;;  %v2486_v7 = vld [vmem:[#allocation5 + $0x20] ss:$16 sps:$4 sm:$0xff]  }
  0x6f   : > { %581 = vmatpush1.bf16.msra.mxu0 %v2480_v3  ;;  %774 = vmatpush1.bf16.msra.mxu1 %v2481_v4  ;;  %v2487_v8 = vld [vmem:[#allocation5 + $0x28] ss:$16 sps:$4 sm:$0xff]   ;;  %v2488_v9 = vld [vmem:[#allocation5 + $0x44] ss:$16 sps:$4 sm:$0xff]   ;;  %v2490_v10 = vld [vmem:[#allocation5 + $0x4c] ss:$16 sps:$4 sm:$0xff]  }
  0x70   : > { %582 = vmatprep.subr.bf16.mxu0 %v2482_v5  ;;  %775 = vmatprep.subr.bf16.mxu1 %v2484_v6  ;;  %v2492_v11 = vld [vmem:[#allocation5 + $0x40] ss:$16 sps:$4 sm:$0xff]   ;;  %v2493_v12 = vld [vmem:[#allocation5 + $0x48] ss:$16 sps:$4 sm:$0xff]   ;;  %v2494_v13 = vld [vmem:[#allocation5 + $0x64] ss:$16 sps:$4 sm:$0xff]  }
  0x71   : > { %v2496_v14 = vld [vmem:[#allocation5 + $0x6c] ss:$16 sps:$4 sm:$0xff]   ;;  %v2498_v15 = vld [vmem:[#allocation5 + $0x60] ss:$16 sps:$4 sm:$0xff]   ;;  %v2499_v16 = vld [vmem:[#allocation5 + $0x68] ss:$16 sps:$4 sm:$0xff]  }
  0x72   : > { %v2500_v17 = vld [vmem:[#allocation5 + $0x84] ss:$16 sps:$4 sm:$0xff]   ;;  %v2502_v18 = vld [vmem:[#allocation5 + $0x8c] ss:$16 sps:$4 sm:$0xff]   ;;  %v2504_v19 = vld [vmem:[#allocation5 + $0x80] ss:$16 sps:$4 sm:$0xff]  }
  0x73   : > { %583 = vmatpush1.bf16.msra.mxu0 %v2486_v7  ;;  %776 = vmatpush1.bf16.msra.mxu1 %v2487_v8  ;;  %v2505_v20 = vld [vmem:[#allocation5 + $0x88] ss:$16 sps:$4 sm:$0xff]   ;;  %v2506_v21 = vld [vmem:[#allocation5 + $0xa4] ss:$16 sps:$4 sm:$0xff]   ;;  %v2508_v22 = vld [vmem:[#allocation5 + $0xac] ss:$16 sps:$4 sm:$0xff]  }
  0x74   : > { %584 = vmatprep.subr.bf16.mxu0 %v2488_v9  ;;  %777 = vmatprep.subr.bf16.mxu1 %v2490_v10  ;;  %v2510_v23 = vld [vmem:[#allocation5 + $0xa0] ss:$16 sps:$4 sm:$0xff]   ;;  %v2511_v24 = vld [vmem:[#allocation5 + $0xa8] ss:$16 sps:$4 sm:$0xff]   ;;  %v2512_v25 = vld [vmem:[#allocation5 + $0xc4] ss:$16 sps:$4 sm:$0xff]  }
  0x75   : > { %v2514_v26 = vld [vmem:[#allocation5 + $0xcc] ss:$16 sps:$4 sm:$0xff]   ;;  %v2516_v27 = vld [vmem:[#allocation5 + $0xc0] ss:$16 sps:$4 sm:$0xff]   ;;  %v2517_v28 = vld [vmem:[#allocation5 + $0xc8] ss:$16 sps:$4 sm:$0xff]  }
  0x76   : > { %v2518_v29 = vld [vmem:[#allocation5 + $0xe4] ss:$16 sps:$4 sm:$0xff]   ;;  %v2520_v30 = vld [vmem:[#allocation5 + $0xec] ss:$16 sps:$4 sm:$0xff]   ;;  %v2522_v31 = vld [vmem:[#allocation5 + $0xe0] ss:$16 sps:$4 sm:$0xff]  }
  0x77   : > { %585 = vmatpush1.bf16.msra.mxu0 %v2492_v11  ;;  %778 = vmatpush1.bf16.msra.mxu1 %v2493_v12  ;;  %v2523_v32 = vld [vmem:[#allocation5 + $0xe8] ss:$16 sps:$4 sm:$0xff]   ;;  %v318_v33 = vld [vmem:[%s3033_s10] sm:$0xff]  ;;  %v2532_v40 = vld [vmem:[#allocation7 + $0x14] ss:$8 sps:$4 sm:$0xff]   ;;  %s2152_s6 = sshll.u32 %s3029_s24, 9 }
  0x78   : > { %586 = vmatprep.subr.bf16.mxu0 %v2494_v13  ;;  %779 = vmatprep.subr.bf16.mxu1 %v2496_v14  ;;  %v2526_v35 = vld [vmem:[#allocation7 + $0x4] ss:$8 sps:$4 sm:$0xff]   ;;  %v350_v36 = vpack.c.bf16 %v319_v34, %v318_v33  ;;  %v2524_v38 = vld [vmem:[#allocation7] ss:$8 sps:$4 sm:$0xff]   ;;  %v320_v41 = vld [vmem:[%s3033_s10 + $0x10] sm:$0xff]  ;;  %s3272_s9 = scalar_lea.vmem [#allocation8], %s2152_s6 }
  0x79   : > { %v2529_v37 = vld [vmem:[#allocation7 + $0x104] ss:$8 sps:$4 sm:$0xff]   ;;  %v2527_v39 = vld [vmem:[#allocation7 + $0x100] ss:$8 sps:$4 sm:$0xff]   ;;  %v321_v42 = vld [vmem:[%s3033_s10 + $0x18] sm:$0xff]  ;;  %s2257_s11 = sshll.u32 %s2784_s21, 13 }
  0x7a   : > { %v2535_v43 = vld [vmem:[#allocation7 + $0x114] ss:$8 sps:$4 sm:$0xff]   ;;  %v2530_v44 = vld [vmem:[#allocation7 + $0x10] ss:$8 sps:$4 sm:$0xff]   ;;  %v2538_v46 = vld [vmem:[#allocation7 + $0x24] ss:$8 sps:$4 sm:$0xff]   ;;  %v351_v48 = vpack.c.bf16 %v321_v42, %v320_v41  ;;  %s3400_s14 = scalar_lea.hbm %s3459_s5, %s2257_s11 }
  0x7b   : > { %587 = vmatpush1.bf16.msra.mxu0 %v2498_v15  ;;  %780 = vmatpush1.bf16.msra.mxu1 %v2499_v16  ;;  %v2533_v45 = vld [vmem:[#allocation7 + $0x110] ss:$8 sps:$4 sm:$0xff]   ;;  %v2541_v47 = vld [vmem:[#allocation7 + $0x124] ss:$8 sps:$4 sm:$0xff]   ;;  %v2536_v49 = vld [vmem:[#allocation7 + $0x20] ss:$8 sps:$4 sm:$0xff]  }
  0x7c   : > { %588 = vmatprep.subr.bf16.mxu0 %v2500_v17  ;;  %781 = vmatprep.subr.bf16.mxu1 %v2502_v18  ;;  %v2539_v50 = vld [vmem:[#allocation7 + $0x120] ss:$8 sps:$4 sm:$0xff]   ;;  %v2544_v51 = vld [vmem:[#allocation7 + $0x34] ss:$8 sps:$4 sm:$0xff]   ;;  %v2542_v55 = vld [vmem:[#allocation7 + $0x30] ss:$8 sps:$4 sm:$0xff]  }
  0x7d   : > { %v2547_v52 = vld [vmem:[#allocation7 + $0x134] ss:$8 sps:$4 sm:$0xff]   ;;  %v322_v53 = vld [vmem:[%s3033_s10 + $0x20] sm:$0xff]  ;;  %v323_v54 = vld [vmem:[%s3033_s10 + $0x28] sm:$0xff]  ;;  %s2021_s13 = sshll.u32 %s3272_s9, 4  ;;  %s2005_s21 = scalar_lea.sflag [#allocation4], %s3029_s24  ;;  %s3402_s13 = int_to_ptr.vmem [resolvable:$true] %s2021_s13 }
  0x7e   : > { %v2545_v56 = vld [vmem:[#allocation7 + $0x130] ss:$8 sps:$4 sm:$0xff]   ;;  %v2550_v57 = vld [vmem:[#allocation7 + $0x44] ss:$8 sps:$4 sm:$0xff]   ;;  %v352_v59 = vpack.c.bf16 %v323_v54, %v322_v53  ;;  %v2548_v60 = vld [vmem:[#allocation7 + $0x40] ss:$8 sps:$4 sm:$0xff]  }
  0x7f   : > { %589 = vmatpush1.bf16.msra.mxu0 %v2504_v19  ;;  %782 = vmatpush1.bf16.msra.mxu1 %v2505_v20  ;;  %v2553_v58 = vld [vmem:[#allocation7 + $0x144] ss:$8 sps:$4 sm:$0xff]   ;;  %v2551_v61 = vld [vmem:[#allocation7 + $0x140] ss:$8 sps:$4 sm:$0xff]   ;;  %v2556_v62 = vld [vmem:[#allocation7 + $0x54] ss:$8 sps:$4 sm:$0xff]  }
  0x80   : > { %590 = vmatprep.subr.bf16.mxu0 %v2506_v21  ;;  %783 = vmatprep.subr.bf16.mxu1 %v2508_v22  ;;  %v2559_v63 = vld [vmem:[#allocation7 + $0x154] ss:$8 sps:$4 sm:$0xff]   ;;  %v2554_v3 = vld [vmem:[#allocation7 + $0x50] ss:$8 sps:$4 sm:$0xff]   ;;  %v2562_v5 = vld [vmem:[#allocation7 + $0x64] ss:$8 sps:$4 sm:$0xff]  }
  0x81   : > { %v324_v1 = vld [vmem:[%s3033_s10 + $0x30] sm:$0xff]  ;;  %v325_v2 = vld [vmem:[%s3033_s10 + $0x38] sm:$0xff]  ;;  %v2565_v6 = vld [vmem:[#allocation7 + $0x164] ss:$8 sps:$4 sm:$0xff]   ;;  %s2706_s27 = scalar_lea.vmem %s3402_s13, 8192  ;;  %p3476_p12 = scmp.ne.s32.totalorder %s3471_s8, 0 }
  0x82   : > { %v2557_v4 = vld [vmem:[#allocation7 + $0x150] ss:$8 sps:$4 sm:$0xff]   ;;  %v353_v7 = vpack.c.bf16 %v325_v2, %v324_v1  ;;  %v2560_v8 = vld [vmem:[#allocation7 + $0x60] ss:$8 sps:$4 sm:$0xff]   ;;  %v2568_v10 = vld [vmem:[#allocation7 + $0x74] ss:$8 sps:$4 sm:$0xff]   ;;  %p2707_p8 = scmp.ne.s32.totalorder %s3402_s13, %s2706_s27 }
  0x83   : > { %591 = vmatpush1.bf16.msra.mxu0 %v2510_v23  ;;  %784 = vmatpush1.bf16.msra.mxu1 %v2511_v24  ;;  %v2563_v9 = vld [vmem:[#allocation7 + $0x160] ss:$8 sps:$4 sm:$0xff]   ;;  %v2571_v11 = vld [vmem:[#allocation7 + $0x174] ss:$8 sps:$4 sm:$0xff]   ;;  %v2566_v14 = vld [vmem:[#allocation7 + $0x70] ss:$8 sps:$4 sm:$0xff]  }
  0x84   : > { %592 = vmatprep.subr.bf16.mxu0 %v2512_v25  ;;  %785 = vmatprep.subr.bf16.mxu1 %v2514_v26  ;;  %v326_v12 = vld [vmem:[%s3033_s10 + $0x40] sm:$0xff]  ;;  %v327_v13 = vld [vmem:[%s3033_s10 + $0x48] sm:$0xff]  ;;  %v2569_v15 = vld [vmem:[#allocation7 + $0x170] ss:$8 sps:$4 sm:$0xff]   ;;  %p2708_p1 = pnand %p2707_p8, %p3476_p12  ;;  %s2802_s15 = smov [#allocation8]  }
  0x85   : > { %v2574_v16 = vld [vmem:[#allocation7 + $0x84] ss:$8 sps:$4 sm:$0xff]   ;;  %v354_v18 = vpack.c.bf16 %v327_v13, %v326_v12  ;;  %v2572_v19 = vld [vmem:[#allocation7 + $0x80] ss:$8 sps:$4 sm:$0xff]   ;;  %v2580_v21 = vld [vmem:[#allocation7 + $0x94] ss:$8 sps:$4 sm:$0xff]  }
  0x86   : > { %v2577_v17 = vld [vmem:[#allocation7 + $0x184] ss:$8 sps:$4 sm:$0xff]   ;;  %v2575_v20 = vld [vmem:[#allocation7 + $0x180] ss:$8 sps:$4 sm:$0xff]   ;;  %v2583_v22 = vld [vmem:[#allocation7 + $0x194] ss:$8 sps:$4 sm:$0xff]   ;;  %p2709_p10 = pneg %p2708_p1 }
  0x87   : > { %593 = vmatpush1.bf16.msra.mxu0 %v2516_v27  ;;  %786 = vmatpush1.bf16.msra.mxu1 %v2517_v28  ;;  %v328_v23 = vld [vmem:[%s3033_s10 + $0x50] sm:$0xff]  ;;  %v329_v24 = vld [vmem:[%s3033_s10 + $0x58] sm:$0xff]  ;;  %v2586_v27 = vld [vmem:[#allocation7 + $0xa4] ss:$8 sps:$4 sm:$0xff]  }
  0x88   : > { %594 = vmatprep.subr.bf16.mxu0 %v2518_v29  ;;  %787 = vmatprep.subr.bf16.mxu1 %v2520_v30  ;;  %v2578_v25 = vld [vmem:[#allocation7 + $0x90] ss:$8 sps:$4 sm:$0xff]   ;;  %v2589_v28 = vld [vmem:[#allocation7 + $0x1a4] ss:$8 sps:$4 sm:$0xff]   ;;  %v355_v29 = vpack.c.bf16 %v329_v24, %v328_v23  ;;  %v2584_v30 = vld [vmem:[#allocation7 + $0xa0] ss:$8 sps:$4 sm:$0xff]  }
  0x89   : > { %v2581_v26 = vld [vmem:[#allocation7 + $0x190] ss:$8 sps:$4 sm:$0xff]   ;;  %v2595_v33 = vld [vmem:[#allocation7 + $0x1b4] ss:$8 sps:$4 sm:$0xff]   ;;  %v330_v34 = vld [vmem:[%s3033_s10 + $0x60] sm:$0xff] }
  0x8a   : > { %v2596_v41 = vld [vmem:[#allocation7 + $0xc0] ss:$8 sps:$4 sm:$0xff]   ;;  %v341_v1 = vld [vmem:[%s3033_s10 + $0xb8] sm:$0xff] }
  0x8b   : > { %595 = vmatpush1.bf16.msra.mxu0 %v2522_v31  ;;  %788 = vmatpush1.bf16.msra.mxu1 %v2523_v32  ;;  %v2587_v31 = vld [vmem:[#allocation7 + $0x1a0] ss:$8 sps:$4 sm:$0xff]   ;;  %v2592_v32 = vld [vmem:[#allocation7 + $0xb4] ss:$8 sps:$4 sm:$0xff]  }
  0x8c   : > { %1554 = vmatprep.subr.bf16.mxu1 %v2526_v35  ;;  %1747 = vmatprep.subr.bf16.mxu0 %v2529_v37  ;;  %v331_v35 = vld [vmem:[%s3033_s10 + $0x68] sm:$0xff]  ;;  %v2593_v37 = vld [vmem:[#allocation7 + $0x1b0] ss:$8 sps:$4 sm:$0xff]   ;;  %v334_v54 = vld [vmem:[%s3033_s10 + $0x80] sm:$0xff] }
  0x8d   : > { %v2599_v42 = vld [vmem:[#allocation7 + $0x1c0] ss:$8 sps:$4 sm:$0xff]  }
  0x8e   : > { %613 = vmatmul.mubr.bf16.vlgmr.msra.gmra.mrb[0].mxu0 %v350_v36  ;;  %806 = vmatmul.mubr.bf16.vlgmr.msra.gmra.mrb[0].mxu1 %v350_v36  ;;  %v2590_v36 = vld [vmem:[#allocation7 + $0xb0] ss:$8 sps:$4 sm:$0xff]   ;;  %v2611_v53 = vld [vmem:[#allocation7 + $0x1e0] ss:$8 sps:$4 sm:$0xff]  }
  0x8f   : > { %622 = vmatprep.mubr.bf16.mxu0 %v2801_v0  ;;  %815 = vmatprep.mubr.bf16.mxu1 %v2801_v0  ;;  %v346_v13 = vld [vmem:[%s3033_s10 + $0xe0] sm:$0xff] }
  0x90   : > { %1555 = vmatpush1.bf16.msra.mxu1 %v2524_v38  ;;  %1748 = vmatpush1.bf16.msra.mxu0 %v2527_v39  ;;  %v2598_v38 = vld [vmem:[#allocation7 + $0xc4] ss:$8 sps:$4 sm:$0xff]   ;;  %v398_v23 = vld [vmem:[%s3456_s2] sm:$0xf] }
  0x91   : > { %1556 = vmatprep.subr.bf16.mxu1 %v2532_v40  ;;  %1749 = vmatprep.subr.bf16.mxu0 %v2535_v43  ;;  %v2601_v39 = vld [vmem:[#allocation7 + $0x1c4] ss:$8 sps:$4 sm:$0xff]   ;;  %v356_v40 = vpack.c.bf16 %v331_v35, %v330_v34  ;;  %v2604_v43 = vld [vmem:[#allocation7 + $0xd4] ss:$8 sps:$4 sm:$0xff]  }
  0x94   : > { %1557 = vmatpush1.bf16.msra.mxu1 %v2530_v44  ;;  %1750 = vmatpush1.bf16.msra.mxu0 %v2533_v45  ;;  %v2607_v44 = vld [vmem:[#allocation7 + $0x1d4] ss:$8 sps:$4 sm:$0xff]  }
  0x95   : > { %1558 = vmatprep.subr.bf16.mxu1 %v2538_v46  ;;  %1751 = vmatprep.subr.bf16.mxu0 %v2541_v47  ;;  %v332_v45 = vld [vmem:[%s3033_s10 + $0x70] sm:$0xff]  ;;  %v333_v46 = vld [vmem:[%s3033_s10 + $0x78] sm:$0xff] }
  0x96   : > { %623 = vmatmul.mubr.bf16.gmra.mrb[4].mxu0 %v351_v48  ;;  %816 = vmatmul.mubr.bf16.gmra.mrb[4].mxu1 %v351_v48  ;;  %v2602_v47 = vld [vmem:[#allocation7 + $0xd0] ss:$8 sps:$4 sm:$0xff]  }
  0x97   : > { %632 = vmatprep.mubr.bf16.mxu0 %v2801_v0  ;;  %825 = vmatprep.mubr.bf16.mxu1 %v2801_v0  ;;  %v2605_v48 = vld [vmem:[#allocation7 + $0x1d0] ss:$8 sps:$4 sm:$0xff]  }
  0x98   : > { %1559 = vmatpush1.bf16.msra.mxu1 %v2536_v49  ;;  %1752 = vmatpush1.bf16.msra.mxu0 %v2539_v50  ;;  %v2610_v49 = vld [vmem:[#allocation7 + $0xe4] ss:$8 sps:$4 sm:$0xff]  }
  0x99   : > { %1560 = vmatprep.subr.bf16.mxu1 %v2544_v51  ;;  %1753 = vmatprep.subr.bf16.mxu0 %v2547_v52  ;;  %v2613_v50 = vld [vmem:[#allocation7 + $0x1e4] ss:$8 sps:$4 sm:$0xff]   ;;  %v357_v51 = vpack.c.bf16 %v333_v46, %v332_v45  ;;  %v2608_v52 = vld [vmem:[#allocation7 + $0xe0] ss:$8 sps:$4 sm:$0xff]  }
  0x9c   : > { %1561 = vmatpush1.bf16.msra.mxu1 %v2542_v55  ;;  %1754 = vmatpush1.bf16.msra.mxu0 %v2545_v56  ;;  %v335_v55 = vld [vmem:[%s3033_s10 + $0x88] sm:$0xff] }
  0x9d   : > { %1562 = vmatprep.subr.bf16.mxu1 %v2550_v57  ;;  %1755 = vmatprep.subr.bf16.mxu0 %v2553_v58  ;;  %v358_v56 = vpack.c.bf16 %v335_v55, %v334_v54  ;;  %v336_v57 = vld [vmem:[%s3033_s10 + $0x90] sm:$0xff]  ;;  %v337_v58 = vld [vmem:[%s3033_s10 + $0x98] sm:$0xff] }
  0x9e   : > { %633 = vmatmul.mubr.bf16.gmra.mrb[8].mxu0 %v352_v59  ;;  %826 = vmatmul.mubr.bf16.gmra.mrb[8].mxu1 %v352_v59  ;;  %v359_v59 = vpack.c.bf16 %v337_v58, %v336_v57 }
  0x9f   : > { %642 = vmatprep.mubr.bf16.mxu0 %v2801_v0  ;;  %835 = vmatprep.mubr.bf16.mxu1 %v2801_v0 }
  0xa0   : > { %1563 = vmatpush1.bf16.msra.mxu1 %v2548_v60  ;;  %1756 = vmatpush1.bf16.msra.mxu0 %v2551_v61  ;;  %v338_v60 = vld [vmem:[%s3033_s10 + $0xa0] sm:$0xff]  ;;  %v339_v61 = vld [vmem:[%s3033_s10 + $0xa8] sm:$0xff] }
  0xa1   : > { %1564 = vmatprep.subr.bf16.mxu1 %v2556_v62  ;;  %1757 = vmatprep.subr.bf16.mxu0 %v2559_v63  ;;  %v360_v62 = vpack.c.bf16 %v339_v61, %v338_v60  ;;  %v340_v63 = vld [vmem:[%s3033_s10 + $0xb0] sm:$0xff] }
  0xa2   : > { %v361_v2 = vpack.c.bf16 %v341_v1, %v340_v63 }
  0xa4   : > { %1565 = vmatpush1.bf16.msra.mxu1 %v2554_v3  ;;  %1758 = vmatpush1.bf16.msra.mxu0 %v2557_v4  ;;  %v342_v3 = vld [vmem:[%s3033_s10 + $0xc0] sm:$0xff]  ;;  %v2616_v4 = vld [vmem:[#allocation7 + $0xf4] ss:$8 sps:$4 sm:$0xff]  }
  0xa5   : > { %1566 = vmatprep.subr.bf16.mxu1 %v2562_v5  ;;  %1759 = vmatprep.subr.bf16.mxu0 %v2565_v6  ;;  %v2619_v5 = vld [vmem:[#allocation7 + $0x1f4] ss:$8 sps:$4 sm:$0xff]   ;;  %v343_v6 = vld [vmem:[%s3033_s10 + $0xc8] sm:$0xff] }
  0xa6   : > { %643 = vmatmul.mubr.bf16.gmra.mrb[12].mxu0 %v353_v7  ;;  %836 = vmatmul.mubr.bf16.gmra.mrb[12].mxu1 %v353_v7  ;;  %v2614_v7 = vld [vmem:[#allocation7 + $0xf0] ss:$8 sps:$4 sm:$0xff]  }
  0xa7   : > { %652 = vmatprep.mubr.bf16.mxu0 %v2801_v0  ;;  %845 = vmatprep.mubr.bf16.mxu1 %v2801_v0 }
  0xa8   : > { %1567 = vmatpush1.bf16.msra.mxu1 %v2560_v8  ;;  %1760 = vmatpush1.bf16.msra.mxu0 %v2563_v9  ;;  %v2617_v8 = vld [vmem:[#allocation7 + $0x1f0] ss:$8 sps:$4 sm:$0xff]   ;;  %v362_v9 = vpack.c.bf16 %v343_v6, %v342_v3 }
  0xa9   : > { %1568 = vmatprep.subr.bf16.mxu1 %v2568_v10  ;;  %1761 = vmatprep.subr.bf16.mxu0 %v2571_v11  ;;  %v344_v10 = vld [vmem:[%s3033_s10 + $0xd0] sm:$0xff]  ;;  %v345_v11 = vld [vmem:[%s3033_s10 + $0xd8] sm:$0xff] }
  0xaa   : > { %v363_v12 = vpack.c.bf16 %v345_v11, %v344_v10 }
  0xac   : > { %1569 = vmatpush1.bf16.msra.mxu1 %v2566_v14  ;;  %1762 = vmatpush1.bf16.msra.mxu0 %v2569_v15  ;;  %v347_v14 = vld [vmem:[%s3033_s10 + $0xe8] sm:$0xff] }
  0xad   : > { %1570 = vmatprep.subr.bf16.mxu1 %v2574_v16  ;;  %1763 = vmatprep.subr.bf16.mxu0 %v2577_v17  ;;  %v364_v15 = vpack.c.bf16 %v347_v14, %v346_v13  ;;  %v348_v16 = vld [vmem:[%s3033_s10 + $0xf0] sm:$0xff]  ;;  %v349_v17 = vld [vmem:[%s3033_s10 + $0xf8] sm:$0xff]  ;;  %s2710_s10 = sshll.u32 %s2802_s15, 4  ;;  %s2711_s10 = int_to_ptr.vmem [resolvable:$false] %s2710_s10 }
  0xae   : > { %653 = vmatmul.mubr.bf16.gmra.mrb[16].mxu0 %v354_v18  ;;  %846 = vmatmul.mubr.bf16.gmra.mrb[16].mxu1 %v354_v18  ;;  %v365_v18 = vpack.c.bf16 %v349_v17, %v348_v16  ;;  %s2712_s26 = scalar_lea.vmem %s2711_s10, 16384  ;;  %p2713_p3 = scmp.lt.s32.totalorder %s3402_s13, %s2711_s10 }
  0xaf   : > { %662 = vmatprep.mubr.bf16.mxu0 %v2801_v0  ;;  %855 = vmatprep.mubr.bf16.mxu1 %v2801_v0  ;;  %p2714_p5 = scmp.lt.s32.totalorder %s2712_s26, %s2706_s27 }
  0xb0   : > { %1571 = vmatpush1.bf16.msra.mxu1 %v2572_v19  ;;  %1764 = vmatpush1.bf16.msra.mxu0 %v2575_v20  ;;  %v400_v19 = vlaneseq }
  0xb1   : > { %1572 = vmatprep.subr.bf16.mxu1 %v2580_v21  ;;  %1765 = vmatprep.subr.bf16.mxu0 %v2583_v22  ;;  %p2715_p9 = por %p2714_p5, %p2713_p3 }
  0xb2   : > { %v3107_v20 = vshrl.u32 %v400_v19, 7 }
  0xb3   : > { %p2716_p11 = pnand %p2715_p9, %p2709_p10 }
  0xb4   : > { %1573 = vmatpush1.bf16.msra.mxu1 %v2578_v25  ;;  %1766 = vmatpush1.bf16.msra.mxu0 %v2581_v26  ;;  %v402_v21 = vsub.s32 0, %v3107_v20  ;;  %v410_v22 = vsub.s32 2, %v3107_v20  ;;  %v406_v24 = vsub.s32 1, %v3107_v20 }
  0xb5   : > { %1574 = vmatprep.subr.bf16.mxu1 %v2586_v27  ;;  %1767 = vmatprep.subr.bf16.mxu0 %v2589_v28 }
  0xb6   : > { %663 = vmatmul.mubr.bf16.gmra.mrb[20].mxu0 %v355_v29  ;;  %856 = vmatmul.mubr.bf16.gmra.mrb[20].mxu1 %v355_v29  ;;  %v3118_v25 = vrot.slane %v398_v23, %v402_v21  ;;  %v3120_v26 = vrot.slane %v398_v23, %v410_v22  ;;  %v3124_v27 = vrot.slane %v398_v23, %v406_v24 }
  0xb7   : > { %672 = vmatprep.mubr.bf16.mxu0 %v2801_v0  ;;  %865 = vmatprep.mubr.bf16.mxu1 %v2801_v0 }
  0xb8   : > { %1575 = vmatpush1.bf16.msra.mxu1 %v2584_v30  ;;  %1768 = vmatpush1.bf16.msra.mxu0 %v2587_v31 }
  0xb9   : > { %1576 = vmatprep.subr.bf16.mxu1 %v2592_v32  ;;  %1769 = vmatprep.subr.bf16.mxu0 %v2595_v33 }
  0xbc   : > { %1577 = vmatpush1.bf16.msra.mxu1 %v2590_v36  ;;  %1770 = vmatpush1.bf16.msra.mxu0 %v2593_v37 }
  0xbd   : > { %1578 = vmatprep.subr.bf16.mxu1 %v2598_v38  ;;  %1771 = vmatprep.subr.bf16.mxu0 %v2601_v39 }
  0xbe   : > { %673 = vmatmul.mubr.bf16.gmra.mrb[24].mxu0 %v356_v40  ;;  %866 = vmatmul.mubr.bf16.gmra.mrb[24].mxu1 %v356_v40 }
  0xbf   : > { %682 = vmatprep.mubr.bf16.mxu0 %v2801_v0  ;;  %875 = vmatprep.mubr.bf16.mxu1 %v2801_v0 }
  0xc0   : > { %1579 = vmatpush1.bf16.msra.mxu1 %v2596_v41  ;;  %1772 = vmatpush1.bf16.msra.mxu0 %v2599_v42 }
  0xc1   : > { %1580 = vmatprep.subr.bf16.mxu1 %v2604_v43  ;;  %1773 = vmatprep.subr.bf16.mxu0 %v2607_v44 }
  0xc4   : > { %1581 = vmatpush1.bf16.msra.mxu1 %v2602_v47  ;;  %1774 = vmatpush1.bf16.msra.mxu0 %v2605_v48 }
  0xc5   : > { %1582 = vmatprep.subr.bf16.mxu1 %v2610_v49  ;;  %1775 = vmatprep.subr.bf16.mxu0 %v2613_v50 }
  0xc6   : > { %683 = vmatmul.mubr.bf16.gmra.mrb[28].mxu0 %v357_v51  ;;  %876 = vmatmul.mubr.bf16.gmra.mrb[28].mxu1 %v357_v51 }
  0xc7   : > { %692 = vmatprep.mubr.bf16.mxu0 %v2801_v0  ;;  %885 = vmatprep.mubr.bf16.mxu1 %v2801_v0 }
  0xc8   : > { %1583 = vmatpush1.bf16.msra.mxu1 %v2608_v52  ;;  %1776 = vmatpush1.bf16.msra.mxu0 %v2611_v53 }
  0xc9   : > { %1584 = vmatprep.subr.bf16.mxu1 %v2616_v4  ;;  %1777 = vmatprep.subr.bf16.mxu0 %v2619_v5 }
  0xcc   : > { %1585 = vmatpush1.bf16.msra.mxu1 %v2614_v7  ;;  %1778 = vmatpush1.bf16.msra.mxu0 %v2617_v8 }
  0xce   : > { %693 = vmatmul.mubr.bf16.gmra.mrb[32].mxu0 %v358_v56  ;;  %886 = vmatmul.mubr.bf16.gmra.mrb[32].mxu1 %v358_v56 }
  0xcf   : > { %702 = vmatprep.mubr.bf16.mxu0 %v2801_v0  ;;  %895 = vmatprep.mubr.bf16.mxu1 %v2801_v0 }
  0xd6   : > { %703 = vmatmul.mubr.bf16.gmra.mrb[36].mxu0 %v359_v59  ;;  %896 = vmatmul.mubr.bf16.gmra.mrb[36].mxu1 %v359_v59 }
  0xd7   : > { %712 = vmatprep.mubr.bf16.mxu0 %v2801_v0  ;;  %905 = vmatprep.mubr.bf16.mxu1 %v2801_v0 }
  0xde   : > { %713 = vmatmul.mubr.bf16.gmra.mrb[40].mxu0 %v360_v62  ;;  %906 = vmatmul.mubr.bf16.gmra.mrb[40].mxu1 %v360_v62 }
  0xdf   : > { %722 = vmatprep.mubr.bf16.mxu0 %v2801_v0  ;;  %915 = vmatprep.mubr.bf16.mxu1 %v2801_v0 }
  0xe6   : > { %723 = vmatmul.mubr.bf16.gmra.mrb[44].mxu0 %v361_v2  ;;  %916 = vmatmul.mubr.bf16.gmra.mrb[44].mxu1 %v361_v2 }
  0xe7   : > { %732 = vmatprep.mubr.bf16.mxu0 %v2801_v0  ;;  %925 = vmatprep.mubr.bf16.mxu1 %v2801_v0 }
  0xee   : > { %733 = vmatmul.mubr.bf16.gmra.mrb[48].mxu0 %v362_v9  ;;  %926 = vmatmul.mubr.bf16.gmra.mrb[48].mxu1 %v362_v9 }
  0xef   : > { %742 = vmatprep.mubr.bf16.mxu0 %v2801_v0  ;;  %935 = vmatprep.mubr.bf16.mxu1 %v2801_v0 }
  0xf6   : > { %743 = vmatmul.mubr.bf16.gmra.mrb[52].mxu0 %v363_v12  ;;  %936 = vmatmul.mubr.bf16.gmra.mrb[52].mxu1 %v363_v12 }
  0xf7   : > { %752 = vmatprep.mubr.bf16.mxu0 %v2801_v0  ;;  %945 = vmatprep.mubr.bf16.mxu1 %v2801_v0 }
  0xfe   : > { %753 = vmatmul.mubr.bf16.gmra.mrb[56].mxu0 %v364_v15  ;;  %946 = vmatmul.mubr.bf16.gmra.mrb[56].mxu1 %v364_v15 }
  0xff   : > { %762 = vmatprep.mubr.bf16.mxu0 %v2801_v0  ;;  %955 = vmatprep.mubr.bf16.mxu1 %v2801_v0  ;;  %v414_v0 = vsub.s32 3, %v3107_v20 }
 0x101   : > { %v3126_v28 = vrot.slane %v398_v23, %v414_v0 }
 0x106   : > { %763 = vmatmul.mubr.bf16.gmra.mrb[60].mxu0 %v365_v18  ;;  %956 = vmatmul.mubr.bf16.gmra.mrb[60].mxu1 %v365_v18 }
 0x161   : > { %v614_v29 = vpop.f32.mrb[0].mxu0  ;;  %v807_v30 = vpop.f32.mrb[0].mxu1 }
 0x162   : > { %v615_v31 = vadd.f32 %v614_v29, %v3118_v25  ;;  %v808_v32 = vadd.f32 %v807_v30, %v3120_v26  ;;  %v616_v33 = vpop.f32.mrb[1].mxu0  ;;  %v809_v34 = vpop.f32.mrb[1].mxu1 }
 0x163   : > { %v617_v35 = vadd.f32 %v616_v33, %v3124_v27  ;;  %v810_v36 = vadd.f32 %v809_v34, %v3126_v28  ;;  %v618_v37 = vpop.f32.mrb[2].mxu0  ;;  %v811_v38 = vpop.f32.mrb[2].mxu1 }
 0x164   : > { %v968_v39 = vmax.f32 %v808_v32, 0.0  ;;  %v619_v40 = vadd.f32 %v618_v37, %v3118_v25  ;;  %v812_v41 = vadd.f32 %v811_v38, %v3120_v26  ;;  %v620_v42 = vpop.f32.mrb[3].mxu0  ;;  %v813_v43 = vpop.f32.mrb[3].mxu1  ;;  %v966_v47 = vmax.f32 %v615_v31, 0.0 }
 0x165   : > { %v969_v44 = vmax.f32 %v810_v36, 0.0  ;;  %v621_v45 = vadd.f32 %v620_v42, %v3124_v27  ;;  %v814_v46 = vadd.f32 %v813_v43, %v3126_v28  ;;  %v967_v50 = vmax.f32 %v617_v35, 0.0 }
 0x166   : > { %v970_v48 = vmax.f32 %v619_v40, 0.0  ;;  %v972_v49 = vmax.f32 %v812_v41, 0.0 }
 0x167   : > { %v971_v51 = vmax.f32 %v621_v45, 0.0  ;;  %v973_v52 = vmax.f32 %v814_v46, 0.0 }
 0x168   : > { %v1094_v53 = vpack.c.bf16 %v970_v48, %v966_v47  ;;  %v1096_v54 = vpack.c.bf16 %v972_v49, %v968_v39 }
 0x169   : > { %v1095_v55 = vpack.c.bf16 %v971_v51, %v967_v50  ;;  %v1097_v56 = vpack.c.bf16 %v973_v52, %v969_v44  ;;  %v624_v57 = vpop.f32.mrb[4].mxu0  ;;  %v817_v58 = vpop.f32.mrb[4].mxu1 }
 0x16a   : > { %v625_v59 = vadd.f32 %v624_v57, %v3118_v25  ;;  %v818_v60 = vadd.f32 %v817_v58, %v3120_v26  ;;  %v626_v61 = vpop.f32.mrb[5].mxu0  ;;  %v819_v62 = vpop.f32.mrb[5].mxu1 }
 0x16b   : > { %v627_v63 = vadd.f32 %v626_v61, %v3124_v27  ;;  %v820_v1 = vadd.f32 %v819_v62, %v3126_v28  ;;  %v628_v2 = vpop.f32.mrb[6].mxu0  ;;  %v821_v3 = vpop.f32.mrb[6].mxu1  ;;  %1586 = vmatprep.mubr.bf16.mxu1 %v1095_v55  ;;  %1779 = vmatprep.mubr.bf16.mxu0 %v1097_v56 }
 0x16c   : > { %v976_v4 = vmax.f32 %v818_v60, 0.0  ;;  %v629_v5 = vadd.f32 %v628_v2, %v3118_v25  ;;  %v822_v6 = vadd.f32 %v821_v3, %v3120_v26  ;;  %v630_v7 = vpop.f32.mrb[7].mxu0  ;;  %v823_v8 = vpop.f32.mrb[7].mxu1  ;;  %1587 = vmatmul.mubr.bf16.vlgmr.msra.gmra.mrb[64].mxu1 %v1094_v53  ;;  %1780 = vmatmul.mubr.bf16.vlgmr.msra.gmra.mrb[64].mxu0 %v1096_v54  ;;  %v974_v12 = vmax.f32 %v625_v59, 0.0 }
 0x16d   : > { %v977_v9 = vmax.f32 %v820_v1, 0.0  ;;  %v631_v10 = vadd.f32 %v630_v7, %v3124_v27  ;;  %v824_v11 = vadd.f32 %v823_v8, %v3126_v28  ;;  %v975_v15 = vmax.f32 %v627_v63, 0.0 }
 0x16e   : > { %v978_v13 = vmax.f32 %v629_v5, 0.0  ;;  %v980_v14 = vmax.f32 %v822_v6, 0.0 }
 0x16f   : > { %v979_v16 = vmax.f32 %v631_v10, 0.0  ;;  %v981_v17 = vmax.f32 %v824_v11, 0.0 }
 0x170   : > { %v1098_v18 = vpack.c.bf16 %v978_v13, %v974_v12  ;;  %v1100_v19 = vpack.c.bf16 %v980_v14, %v976_v4 }
 0x171   : > { %v1099_v22 = vpack.c.bf16 %v979_v16, %v975_v15  ;;  %v1101_v23 = vpack.c.bf16 %v981_v17, %v977_v9  ;;  %v634_v0 = vpop.f32.mrb[8].mxu0  ;;  %v827_v29 = vpop.f32.mrb[8].mxu1 }
 0x172   : > { %v635_v30 = vadd.f32 %v634_v0, %v3118_v25  ;;  %v828_v31 = vadd.f32 %v827_v29, %v3120_v26  ;;  %v636_v32 = vpop.f32.mrb[9].mxu0  ;;  %v829_v33 = vpop.f32.mrb[9].mxu1 }
 0x173   : > { %v637_v34 = vadd.f32 %v636_v32, %v3124_v27  ;;  %v830_v35 = vadd.f32 %v829_v33, %v3126_v28  ;;  %v638_v36 = vpop.f32.mrb[10].mxu0  ;;  %v831_v37 = vpop.f32.mrb[10].mxu1  ;;  %1596 = vmatprep.mubr.bf16.mxu1 %v1099_v22  ;;  %1789 = vmatprep.mubr.bf16.mxu0 %v1101_v23 }
 0x174   : > { %v984_v38 = vmax.f32 %v828_v31, 0.0  ;;  %v639_v39 = vadd.f32 %v638_v36, %v3118_v25  ;;  %v832_v40 = vadd.f32 %v831_v37, %v3120_v26  ;;  %v640_v41 = vpop.f32.mrb[11].mxu0  ;;  %v833_v42 = vpop.f32.mrb[11].mxu1  ;;  %1597 = vmatmul.mubr.bf16.gmra.mrb[68].mxu1 %v1098_v18  ;;  %1790 = vmatmul.mubr.bf16.gmra.mrb[68].mxu0 %v1100_v19  ;;  %v982_v46 = vmax.f32 %v635_v30, 0.0 }
 0x175   : > { %v985_v43 = vmax.f32 %v830_v35, 0.0  ;;  %v641_v44 = vadd.f32 %v640_v41, %v3124_v27  ;;  %v834_v45 = vadd.f32 %v833_v42, %v3126_v28  ;;  %v983_v49 = vmax.f32 %v637_v34, 0.0 }
 0x176   : > { %v986_v47 = vmax.f32 %v639_v39, 0.0  ;;  %v988_v48 = vmax.f32 %v832_v40, 0.0 }
 0x177   : > { %v987_v50 = vmax.f32 %v641_v44, 0.0  ;;  %v989_v51 = vmax.f32 %v834_v45, 0.0 }
 0x178   : > { %v1102_v52 = vpack.c.bf16 %v986_v47, %v982_v46  ;;  %v1104_v53 = vpack.c.bf16 %v988_v48, %v984_v38 }
 0x179   : > { %v1103_v54 = vpack.c.bf16 %v987_v50, %v983_v49  ;;  %v1105_v55 = vpack.c.bf16 %v989_v51, %v985_v43  ;;  %v644_v56 = vpop.f32.mrb[12].mxu0  ;;  %v837_v57 = vpop.f32.mrb[12].mxu1 }
 0x17a   : > { %v645_v58 = vadd.f32 %v644_v56, %v3118_v25  ;;  %v838_v59 = vadd.f32 %v837_v57, %v3120_v26  ;;  %v646_v60 = vpop.f32.mrb[13].mxu0  ;;  %v839_v61 = vpop.f32.mrb[13].mxu1 }
 0x17b   : > { %v647_v62 = vadd.f32 %v646_v60, %v3124_v27  ;;  %v840_v63 = vadd.f32 %v839_v61, %v3126_v28  ;;  %v648_v1 = vpop.f32.mrb[14].mxu0  ;;  %v841_v2 = vpop.f32.mrb[14].mxu1  ;;  %1606 = vmatprep.mubr.bf16.mxu1 %v1103_v54  ;;  %1799 = vmatprep.mubr.bf16.mxu0 %v1105_v55 }
 0x17c   : > { %v992_v3 = vmax.f32 %v838_v59, 0.0  ;;  %v649_v4 = vadd.f32 %v648_v1, %v3118_v25  ;;  %v842_v5 = vadd.f32 %v841_v2, %v3120_v26  ;;  %v650_v6 = vpop.f32.mrb[15].mxu0  ;;  %v843_v7 = vpop.f32.mrb[15].mxu1  ;;  %1607 = vmatmul.mubr.bf16.gmra.mrb[72].mxu1 %v1102_v52  ;;  %1800 = vmatmul.mubr.bf16.gmra.mrb[72].mxu0 %v1104_v53  ;;  %v990_v11 = vmax.f32 %v645_v58, 0.0 }
 0x17d   : > { %v993_v8 = vmax.f32 %v840_v63, 0.0  ;;  %v651_v9 = vadd.f32 %v650_v6, %v3124_v27  ;;  %v844_v10 = vadd.f32 %v843_v7, %v3126_v28  ;;  %v991_v14 = vmax.f32 %v647_v62, 0.0 }
 0x17e   : > { %v994_v12 = vmax.f32 %v649_v4, 0.0  ;;  %v996_v13 = vmax.f32 %v842_v5, 0.0 }
 0x17f   : > { %v995_v15 = vmax.f32 %v651_v9, 0.0  ;;  %v997_v16 = vmax.f32 %v844_v10, 0.0 }
 0x180   : > { %v1106_v17 = vpack.c.bf16 %v994_v12, %v990_v11  ;;  %v1108_v18 = vpack.c.bf16 %v996_v13, %v992_v3 }
 0x181   : > { %v1107_v19 = vpack.c.bf16 %v995_v15, %v991_v14  ;;  %v1109_v22 = vpack.c.bf16 %v997_v16, %v993_v8  ;;  %v654_v23 = vpop.f32.mrb[16].mxu0  ;;  %v847_v0 = vpop.f32.mrb[16].mxu1 }
 0x182   : > { %v655_v29 = vadd.f32 %v654_v23, %v3118_v25  ;;  %v848_v30 = vadd.f32 %v847_v0, %v3120_v26  ;;  %v656_v31 = vpop.f32.mrb[17].mxu0  ;;  %v849_v32 = vpop.f32.mrb[17].mxu1 }
 0x183   : > { %v657_v33 = vadd.f32 %v656_v31, %v3124_v27  ;;  %v850_v34 = vadd.f32 %v849_v32, %v3126_v28  ;;  %v658_v35 = vpop.f32.mrb[18].mxu0  ;;  %v851_v36 = vpop.f32.mrb[18].mxu1  ;;  %1616 = vmatprep.mubr.bf16.mxu1 %v1107_v19  ;;  %1809 = vmatprep.mubr.bf16.mxu0 %v1109_v22 }
 0x184   : > { %v1000_v37 = vmax.f32 %v848_v30, 0.0  ;;  %v659_v38 = vadd.f32 %v658_v35, %v3118_v25  ;;  %v852_v39 = vadd.f32 %v851_v36, %v3120_v26  ;;  %v660_v40 = vpop.f32.mrb[19].mxu0  ;;  %v853_v41 = vpop.f32.mrb[19].mxu1  ;;  %1617 = vmatmul.mubr.bf16.gmra.mrb[76].mxu1 %v1106_v17  ;;  %1810 = vmatmul.mubr.bf16.gmra.mrb[76].mxu0 %v1108_v18  ;;  %v998_v45 = vmax.f32 %v655_v29, 0.0 }
 0x185   : > { %v1001_v42 = vmax.f32 %v850_v34, 0.0  ;;  %v661_v43 = vadd.f32 %v660_v40, %v3124_v27  ;;  %v854_v44 = vadd.f32 %v853_v41, %v3126_v28  ;;  %v999_v48 = vmax.f32 %v657_v33, 0.0 }
 0x186   : > { %v1002_v46 = vmax.f32 %v659_v38, 0.0  ;;  %v1004_v47 = vmax.f32 %v852_v39, 0.0 }
 0x187   : > { %v1003_v49 = vmax.f32 %v661_v43, 0.0  ;;  %v1005_v50 = vmax.f32 %v854_v44, 0.0 }
 0x188   : > { %v1110_v51 = vpack.c.bf16 %v1002_v46, %v998_v45  ;;  %v1112_v52 = vpack.c.bf16 %v1004_v47, %v1000_v37 }
 0x189   : > { %v1111_v53 = vpack.c.bf16 %v1003_v49, %v999_v48  ;;  %v1113_v54 = vpack.c.bf16 %v1005_v50, %v1001_v42  ;;  %v664_v55 = vpop.f32.mrb[20].mxu0  ;;  %v857_v56 = vpop.f32.mrb[20].mxu1 }
 0x18a   : > { %v665_v57 = vadd.f32 %v664_v55, %v3118_v25  ;;  %v858_v58 = vadd.f32 %v857_v56, %v3120_v26  ;;  %v666_v59 = vpop.f32.mrb[21].mxu0  ;;  %v859_v60 = vpop.f32.mrb[21].mxu1 }
 0x18b   : > { %v667_v61 = vadd.f32 %v666_v59, %v3124_v27  ;;  %v860_v62 = vadd.f32 %v859_v60, %v3126_v28  ;;  %v668_v63 = vpop.f32.mrb[22].mxu0  ;;  %v861_v1 = vpop.f32.mrb[22].mxu1  ;;  %1626 = vmatprep.mubr.bf16.mxu1 %v1111_v53  ;;  %1819 = vmatprep.mubr.bf16.mxu0 %v1113_v54 }
 0x18c   : > { %v1008_v2 = vmax.f32 %v858_v58, 0.0  ;;  %v669_v3 = vadd.f32 %v668_v63, %v3118_v25  ;;  %v862_v4 = vadd.f32 %v861_v1, %v3120_v26  ;;  %v670_v5 = vpop.f32.mrb[23].mxu0  ;;  %v863_v6 = vpop.f32.mrb[23].mxu1  ;;  %1627 = vmatmul.mubr.bf16.gmra.mrb[80].mxu1 %v1110_v51  ;;  %1820 = vmatmul.mubr.bf16.gmra.mrb[80].mxu0 %v1112_v52  ;;  %v1006_v10 = vmax.f32 %v665_v57, 0.0 }
 0x18d   : > { %v1009_v7 = vmax.f32 %v860_v62, 0.0  ;;  %v671_v8 = vadd.f32 %v670_v5, %v3124_v27  ;;  %v864_v9 = vadd.f32 %v863_v6, %v3126_v28  ;;  %v1007_v13 = vmax.f32 %v667_v61, 0.0 }
 0x18e   : > { %v1010_v11 = vmax.f32 %v669_v3, 0.0  ;;  %v1012_v12 = vmax.f32 %v862_v4, 0.0 }
 0x18f   : > { %v1011_v14 = vmax.f32 %v671_v8, 0.0  ;;  %v1013_v15 = vmax.f32 %v864_v9, 0.0 }
 0x190   : > { %v1114_v16 = vpack.c.bf16 %v1010_v11, %v1006_v10  ;;  %v1116_v17 = vpack.c.bf16 %v1012_v12, %v1008_v2 }
 0x191   : > { %v1115_v18 = vpack.c.bf16 %v1011_v14, %v1007_v13  ;;  %v1117_v19 = vpack.c.bf16 %v1013_v15, %v1009_v7  ;;  %v674_v22 = vpop.f32.mrb[24].mxu0  ;;  %v867_v23 = vpop.f32.mrb[24].mxu1 }
 0x192   : > { %v675_v0 = vadd.f32 %v674_v22, %v3118_v25  ;;  %v868_v29 = vadd.f32 %v867_v23, %v3120_v26  ;;  %v676_v30 = vpop.f32.mrb[25].mxu0  ;;  %v869_v31 = vpop.f32.mrb[25].mxu1 }
 0x193   : > { %v677_v32 = vadd.f32 %v676_v30, %v3124_v27  ;;  %v870_v33 = vadd.f32 %v869_v31, %v3126_v28  ;;  %v678_v34 = vpop.f32.mrb[26].mxu0  ;;  %v871_v35 = vpop.f32.mrb[26].mxu1  ;;  %1636 = vmatprep.mubr.bf16.mxu1 %v1115_v18  ;;  %1829 = vmatprep.mubr.bf16.mxu0 %v1117_v19 }
 0x194   : > { %v1016_v36 = vmax.f32 %v868_v29, 0.0  ;;  %v679_v37 = vadd.f32 %v678_v34, %v3118_v25  ;;  %v872_v38 = vadd.f32 %v871_v35, %v3120_v26  ;;  %v680_v39 = vpop.f32.mrb[27].mxu0  ;;  %v873_v40 = vpop.f32.mrb[27].mxu1  ;;  %1637 = vmatmul.mubr.bf16.gmra.mrb[84].mxu1 %v1114_v16  ;;  %1830 = vmatmul.mubr.bf16.gmra.mrb[84].mxu0 %v1116_v17  ;;  %v1014_v44 = vmax.f32 %v675_v0, 0.0 }
 0x195   : > { %v1017_v41 = vmax.f32 %v870_v33, 0.0  ;;  %v681_v42 = vadd.f32 %v680_v39, %v3124_v27  ;;  %v874_v43 = vadd.f32 %v873_v40, %v3126_v28  ;;  %v1015_v47 = vmax.f32 %v677_v32, 0.0 }
 0x196   : > { %v1018_v45 = vmax.f32 %v679_v37, 0.0  ;;  %v1020_v46 = vmax.f32 %v872_v38, 0.0 }
 0x197   : > { %v1019_v48 = vmax.f32 %v681_v42, 0.0  ;;  %v1021_v49 = vmax.f32 %v874_v43, 0.0 }
 0x198   : > { %v1118_v50 = vpack.c.bf16 %v1018_v45, %v1014_v44  ;;  %v1120_v51 = vpack.c.bf16 %v1020_v46, %v1016_v36 }
 0x199   : > { %v1119_v52 = vpack.c.bf16 %v1019_v48, %v1015_v47  ;;  %v1121_v53 = vpack.c.bf16 %v1021_v49, %v1017_v41  ;;  %v684_v54 = vpop.f32.mrb[28].mxu0  ;;  %v877_v55 = vpop.f32.mrb[28].mxu1 }
 0x19a   : > { %v685_v56 = vadd.f32 %v684_v54, %v3118_v25  ;;  %v878_v57 = vadd.f32 %v877_v55, %v3120_v26  ;;  %v686_v58 = vpop.f32.mrb[29].mxu0  ;;  %v879_v59 = vpop.f32.mrb[29].mxu1 }
 0x19b   : > { %v687_v60 = vadd.f32 %v686_v58, %v3124_v27  ;;  %v880_v61 = vadd.f32 %v879_v59, %v3126_v28  ;;  %v688_v62 = vpop.f32.mrb[30].mxu0  ;;  %v881_v63 = vpop.f32.mrb[30].mxu1  ;;  %1646 = vmatprep.mubr.bf16.mxu1 %v1119_v52  ;;  %1839 = vmatprep.mubr.bf16.mxu0 %v1121_v53 }
 0x19c   : > { %v1024_v1 = vmax.f32 %v878_v57, 0.0  ;;  %v689_v2 = vadd.f32 %v688_v62, %v3118_v25  ;;  %v882_v3 = vadd.f32 %v881_v63, %v3120_v26  ;;  %v690_v4 = vpop.f32.mrb[31].mxu0  ;;  %v883_v5 = vpop.f32.mrb[31].mxu1  ;;  %1647 = vmatmul.mubr.bf16.gmra.mrb[88].mxu1 %v1118_v50  ;;  %1840 = vmatmul.mubr.bf16.gmra.mrb[88].mxu0 %v1120_v51  ;;  %v1022_v9 = vmax.f32 %v685_v56, 0.0 }
 0x19d   : > { %v1025_v6 = vmax.f32 %v880_v61, 0.0  ;;  %v691_v7 = vadd.f32 %v690_v4, %v3124_v27  ;;  %v884_v8 = vadd.f32 %v883_v5, %v3126_v28  ;;  %v1023_v12 = vmax.f32 %v687_v60, 0.0 }
 0x19e   : > { %v1026_v10 = vmax.f32 %v689_v2, 0.0  ;;  %v1028_v11 = vmax.f32 %v882_v3, 0.0 }
 0x19f   : > { %v1027_v13 = vmax.f32 %v691_v7, 0.0  ;;  %v1029_v14 = vmax.f32 %v884_v8, 0.0 }
 0x1a0   : > { %v1122_v15 = vpack.c.bf16 %v1026_v10, %v1022_v9  ;;  %v1124_v16 = vpack.c.bf16 %v1028_v11, %v1024_v1 }
 0x1a1   : > { %v1123_v17 = vpack.c.bf16 %v1027_v13, %v1023_v12  ;;  %v1125_v18 = vpack.c.bf16 %v1029_v14, %v1025_v6  ;;  %v694_v19 = vpop.f32.mrb[32].mxu0  ;;  %v887_v22 = vpop.f32.mrb[32].mxu1 }
 0x1a2   : > { %v695_v23 = vadd.f32 %v694_v19, %v3118_v25  ;;  %v888_v0 = vadd.f32 %v887_v22, %v3120_v26  ;;  %v696_v29 = vpop.f32.mrb[33].mxu0  ;;  %v889_v30 = vpop.f32.mrb[33].mxu1 }
 0x1a3   : > { %v697_v31 = vadd.f32 %v696_v29, %v3124_v27  ;;  %v890_v32 = vadd.f32 %v889_v30, %v3126_v28  ;;  %v698_v33 = vpop.f32.mrb[34].mxu0  ;;  %v891_v34 = vpop.f32.mrb[34].mxu1  ;;  %1656 = vmatprep.mubr.bf16.mxu1 %v1123_v17  ;;  %1849 = vmatprep.mubr.bf16.mxu0 %v1125_v18 }
 0x1a4   : > { %v1032_v35 = vmax.f32 %v888_v0, 0.0  ;;  %v699_v36 = vadd.f32 %v698_v33, %v3118_v25  ;;  %v892_v37 = vadd.f32 %v891_v34, %v3120_v26  ;;  %v700_v38 = vpop.f32.mrb[35].mxu0  ;;  %v893_v39 = vpop.f32.mrb[35].mxu1  ;;  %1657 = vmatmul.mubr.bf16.gmra.mrb[92].mxu1 %v1122_v15  ;;  %1850 = vmatmul.mubr.bf16.gmra.mrb[92].mxu0 %v1124_v16  ;;  %v1030_v43 = vmax.f32 %v695_v23, 0.0 }
 0x1a5   : > { %v1033_v40 = vmax.f32 %v890_v32, 0.0  ;;  %v701_v41 = vadd.f32 %v700_v38, %v3124_v27  ;;  %v894_v42 = vadd.f32 %v893_v39, %v3126_v28  ;;  %v1031_v46 = vmax.f32 %v697_v31, 0.0 }
 0x1a6   : > { %v1034_v44 = vmax.f32 %v699_v36, 0.0  ;;  %v1036_v45 = vmax.f32 %v892_v37, 0.0 }
 0x1a7   : > { %v1035_v47 = vmax.f32 %v701_v41, 0.0  ;;  %v1037_v48 = vmax.f32 %v894_v42, 0.0 }
 0x1a8   : > { %v1126_v49 = vpack.c.bf16 %v1034_v44, %v1030_v43  ;;  %v1128_v50 = vpack.c.bf16 %v1036_v45, %v1032_v35 }
 0x1a9   : > { %v1127_v51 = vpack.c.bf16 %v1035_v47, %v1031_v46  ;;  %v1129_v52 = vpack.c.bf16 %v1037_v48, %v1033_v40  ;;  %v704_v53 = vpop.f32.mrb[36].mxu0  ;;  %v897_v54 = vpop.f32.mrb[36].mxu1 }
 0x1aa   : > { %v705_v55 = vadd.f32 %v704_v53, %v3118_v25  ;;  %v898_v56 = vadd.f32 %v897_v54, %v3120_v26  ;;  %v706_v57 = vpop.f32.mrb[37].mxu0  ;;  %v899_v58 = vpop.f32.mrb[37].mxu1 }
 0x1ab   : > { %v707_v59 = vadd.f32 %v706_v57, %v3124_v27  ;;  %v900_v60 = vadd.f32 %v899_v58, %v3126_v28  ;;  %v708_v61 = vpop.f32.mrb[38].mxu0  ;;  %v901_v62 = vpop.f32.mrb[38].mxu1  ;;  %1666 = vmatprep.mubr.bf16.mxu1 %v1127_v51  ;;  %1859 = vmatprep.mubr.bf16.mxu0 %v1129_v52 }
 0x1ac   : > { %v1040_v63 = vmax.f32 %v898_v56, 0.0  ;;  %v709_v1 = vadd.f32 %v708_v61, %v3118_v25  ;;  %v902_v2 = vadd.f32 %v901_v62, %v3120_v26  ;;  %v710_v3 = vpop.f32.mrb[39].mxu0  ;;  %v903_v4 = vpop.f32.mrb[39].mxu1  ;;  %1667 = vmatmul.mubr.bf16.gmra.mrb[96].mxu1 %v1126_v49  ;;  %1860 = vmatmul.mubr.bf16.gmra.mrb[96].mxu0 %v1128_v50  ;;  %v1038_v8 = vmax.f32 %v705_v55, 0.0 }
 0x1ad   : > { %v1041_v5 = vmax.f32 %v900_v60, 0.0  ;;  %v711_v6 = vadd.f32 %v710_v3, %v3124_v27  ;;  %v904_v7 = vadd.f32 %v903_v4, %v3126_v28  ;;  %v1039_v11 = vmax.f32 %v707_v59, 0.0 }
 0x1ae   : > { %v1042_v9 = vmax.f32 %v709_v1, 0.0  ;;  %v1044_v10 = vmax.f32 %v902_v2, 0.0 }
 0x1af   : > { %v1043_v12 = vmax.f32 %v711_v6, 0.0  ;;  %v1045_v13 = vmax.f32 %v904_v7, 0.0 }
 0x1b0   : > { %v1130_v14 = vpack.c.bf16 %v1042_v9, %v1038_v8  ;;  %v1132_v15 = vpack.c.bf16 %v1044_v10, %v1040_v63 }
 0x1b1   : > { %v1131_v16 = vpack.c.bf16 %v1043_v12, %v1039_v11  ;;  %v1133_v17 = vpack.c.bf16 %v1045_v13, %v1041_v5  ;;  %v714_v18 = vpop.f32.mrb[40].mxu0  ;;  %v907_v19 = vpop.f32.mrb[40].mxu1 }
 0x1b2   : > { %v715_v22 = vadd.f32 %v714_v18, %v3118_v25  ;;  %v908_v23 = vadd.f32 %v907_v19, %v3120_v26  ;;  %v716_v0 = vpop.f32.mrb[41].mxu0  ;;  %v909_v29 = vpop.f32.mrb[41].mxu1 }
 0x1b3   : > { %v717_v30 = vadd.f32 %v716_v0, %v3124_v27  ;;  %v910_v31 = vadd.f32 %v909_v29, %v3126_v28  ;;  %v718_v32 = vpop.f32.mrb[42].mxu0  ;;  %v911_v33 = vpop.f32.mrb[42].mxu1  ;;  %1676 = vmatprep.mubr.bf16.mxu1 %v1131_v16  ;;  %1869 = vmatprep.mubr.bf16.mxu0 %v1133_v17 }
 0x1b4   : > { %v1048_v34 = vmax.f32 %v908_v23, 0.0  ;;  %v719_v35 = vadd.f32 %v718_v32, %v3118_v25  ;;  %v912_v36 = vadd.f32 %v911_v33, %v3120_v26  ;;  %v720_v37 = vpop.f32.mrb[43].mxu0  ;;  %v913_v38 = vpop.f32.mrb[43].mxu1  ;;  %1677 = vmatmul.mubr.bf16.gmra.mrb[100].mxu1 %v1130_v14  ;;  %1870 = vmatmul.mubr.bf16.gmra.mrb[100].mxu0 %v1132_v15  ;;  %v1046_v42 = vmax.f32 %v715_v22, 0.0 }
 0x1b5   : > { %v1049_v39 = vmax.f32 %v910_v31, 0.0  ;;  %v721_v40 = vadd.f32 %v720_v37, %v3124_v27  ;;  %v914_v41 = vadd.f32 %v913_v38, %v3126_v28  ;;  %v1047_v45 = vmax.f32 %v717_v30, 0.0 }
 0x1b6   : > { %v1050_v43 = vmax.f32 %v719_v35, 0.0  ;;  %v1052_v44 = vmax.f32 %v912_v36, 0.0 }
 0x1b7   : > { %v1051_v46 = vmax.f32 %v721_v40, 0.0  ;;  %v1053_v47 = vmax.f32 %v914_v41, 0.0 }
 0x1b8   : > { %v1134_v48 = vpack.c.bf16 %v1050_v43, %v1046_v42  ;;  %v1136_v49 = vpack.c.bf16 %v1052_v44, %v1048_v34 }
 0x1b9   : > { %v1135_v50 = vpack.c.bf16 %v1051_v46, %v1047_v45  ;;  %v1137_v51 = vpack.c.bf16 %v1053_v47, %v1049_v39  ;;  %v724_v52 = vpop.f32.mrb[44].mxu0  ;;  %v917_v53 = vpop.f32.mrb[44].mxu1 }
 0x1ba   : > { %v725_v54 = vadd.f32 %v724_v52, %v3118_v25  ;;  %v918_v55 = vadd.f32 %v917_v53, %v3120_v26  ;;  %v726_v56 = vpop.f32.mrb[45].mxu0  ;;  %v919_v57 = vpop.f32.mrb[45].mxu1 }
 0x1bb   : > { %v727_v58 = vadd.f32 %v726_v56, %v3124_v27  ;;  %v920_v59 = vadd.f32 %v919_v57, %v3126_v28  ;;  %v728_v60 = vpop.f32.mrb[46].mxu0  ;;  %v921_v61 = vpop.f32.mrb[46].mxu1  ;;  %1686 = vmatprep.mubr.bf16.mxu1 %v1135_v50  ;;  %1879 = vmatprep.mubr.bf16.mxu0 %v1137_v51 }
 0x1bc   : > { %v1056_v62 = vmax.f32 %v918_v55, 0.0  ;;  %v729_v63 = vadd.f32 %v728_v60, %v3118_v25  ;;  %v922_v1 = vadd.f32 %v921_v61, %v3120_v26  ;;  %v730_v2 = vpop.f32.mrb[47].mxu0  ;;  %v923_v3 = vpop.f32.mrb[47].mxu1  ;;  %1687 = vmatmul.mubr.bf16.gmra.mrb[104].mxu1 %v1134_v48  ;;  %1880 = vmatmul.mubr.bf16.gmra.mrb[104].mxu0 %v1136_v49  ;;  %v1054_v7 = vmax.f32 %v725_v54, 0.0 }
 0x1bd   : > { %v1057_v4 = vmax.f32 %v920_v59, 0.0  ;;  %v731_v5 = vadd.f32 %v730_v2, %v3124_v27  ;;  %v924_v6 = vadd.f32 %v923_v3, %v3126_v28  ;;  %v1055_v10 = vmax.f32 %v727_v58, 0.0 }
 0x1be   : > { %v1058_v8 = vmax.f32 %v729_v63, 0.0  ;;  %v1060_v9 = vmax.f32 %v922_v1, 0.0 }
 0x1bf   : > { %v1059_v11 = vmax.f32 %v731_v5, 0.0  ;;  %v1061_v12 = vmax.f32 %v924_v6, 0.0 }
 0x1c0   : > { %v1138_v13 = vpack.c.bf16 %v1058_v8, %v1054_v7  ;;  %v1140_v14 = vpack.c.bf16 %v1060_v9, %v1056_v62 }
 0x1c1   : > { %v1139_v15 = vpack.c.bf16 %v1059_v11, %v1055_v10  ;;  %v1141_v16 = vpack.c.bf16 %v1061_v12, %v1057_v4  ;;  %v734_v17 = vpop.f32.mrb[48].mxu0  ;;  %v927_v18 = vpop.f32.mrb[48].mxu1 }
 0x1c2   : > { %v735_v19 = vadd.f32 %v734_v17, %v3118_v25  ;;  %v928_v22 = vadd.f32 %v927_v18, %v3120_v26  ;;  %v736_v23 = vpop.f32.mrb[49].mxu0  ;;  %v929_v0 = vpop.f32.mrb[49].mxu1 }
 0x1c3   : > { %v737_v29 = vadd.f32 %v736_v23, %v3124_v27  ;;  %v930_v30 = vadd.f32 %v929_v0, %v3126_v28  ;;  %v738_v31 = vpop.f32.mrb[50].mxu0  ;;  %v931_v32 = vpop.f32.mrb[50].mxu1  ;;  %1696 = vmatprep.mubr.bf16.mxu1 %v1139_v15  ;;  %1889 = vmatprep.mubr.bf16.mxu0 %v1141_v16 }
 0x1c4   : > { %v1064_v33 = vmax.f32 %v928_v22, 0.0  ;;  %v739_v34 = vadd.f32 %v738_v31, %v3118_v25  ;;  %v932_v35 = vadd.f32 %v931_v32, %v3120_v26  ;;  %v740_v36 = vpop.f32.mrb[51].mxu0  ;;  %v933_v37 = vpop.f32.mrb[51].mxu1  ;;  %1697 = vmatmul.mubr.bf16.gmra.mrb[108].mxu1 %v1138_v13  ;;  %1890 = vmatmul.mubr.bf16.gmra.mrb[108].mxu0 %v1140_v14  ;;  %v1062_v41 = vmax.f32 %v735_v19, 0.0 }
 0x1c5   : > { %v1065_v38 = vmax.f32 %v930_v30, 0.0  ;;  %v741_v39 = vadd.f32 %v740_v36, %v3124_v27  ;;  %v934_v40 = vadd.f32 %v933_v37, %v3126_v28  ;;  %v1063_v44 = vmax.f32 %v737_v29, 0.0 }
 0x1c6   : > { %v1066_v42 = vmax.f32 %v739_v34, 0.0  ;;  %v1068_v43 = vmax.f32 %v932_v35, 0.0 }
 0x1c7   : > { %v1067_v45 = vmax.f32 %v741_v39, 0.0  ;;  %v1069_v46 = vmax.f32 %v934_v40, 0.0 }
 0x1c8   : > { %v1142_v47 = vpack.c.bf16 %v1066_v42, %v1062_v41  ;;  %v1144_v48 = vpack.c.bf16 %v1068_v43, %v1064_v33 }
 0x1c9   : > { %v1143_v49 = vpack.c.bf16 %v1067_v45, %v1063_v44  ;;  %v1145_v50 = vpack.c.bf16 %v1069_v46, %v1065_v38  ;;  %v744_v51 = vpop.f32.mrb[52].mxu0  ;;  %v937_v52 = vpop.f32.mrb[52].mxu1 }
 0x1ca   : > { %v745_v53 = vadd.f32 %v744_v51, %v3118_v25  ;;  %v938_v54 = vadd.f32 %v937_v52, %v3120_v26  ;;  %v746_v55 = vpop.f32.mrb[53].mxu0  ;;  %v939_v56 = vpop.f32.mrb[53].mxu1 }
 0x1cb   : > { %v747_v57 = vadd.f32 %v746_v55, %v3124_v27  ;;  %v940_v58 = vadd.f32 %v939_v56, %v3126_v28  ;;  %v748_v59 = vpop.f32.mrb[54].mxu0  ;;  %v941_v60 = vpop.f32.mrb[54].mxu1  ;;  %1706 = vmatprep.mubr.bf16.mxu1 %v1143_v49  ;;  %1899 = vmatprep.mubr.bf16.mxu0 %v1145_v50 }
 0x1cc   : > { %v1072_v61 = vmax.f32 %v938_v54, 0.0  ;;  %v749_v62 = vadd.f32 %v748_v59, %v3118_v25  ;;  %v942_v63 = vadd.f32 %v941_v60, %v3120_v26  ;;  %v750_v1 = vpop.f32.mrb[55].mxu0  ;;  %v943_v2 = vpop.f32.mrb[55].mxu1  ;;  %1707 = vmatmul.mubr.bf16.gmra.mrb[112].mxu1 %v1142_v47  ;;  %1900 = vmatmul.mubr.bf16.gmra.mrb[112].mxu0 %v1144_v48  ;;  %v1070_v6 = vmax.f32 %v745_v53, 0.0 }
 0x1cd   : > { %v1073_v3 = vmax.f32 %v940_v58, 0.0  ;;  %v751_v4 = vadd.f32 %v750_v1, %v3124_v27  ;;  %v944_v5 = vadd.f32 %v943_v2, %v3126_v28  ;;  %v1071_v9 = vmax.f32 %v747_v57, 0.0 }
 0x1ce   : > { %v1074_v7 = vmax.f32 %v749_v62, 0.0  ;;  %v1076_v8 = vmax.f32 %v942_v63, 0.0 }
 0x1cf   : > { %v1075_v10 = vmax.f32 %v751_v4, 0.0  ;;  %v1077_v11 = vmax.f32 %v944_v5, 0.0 }
 0x1d0   : > { %v1146_v12 = vpack.c.bf16 %v1074_v7, %v1070_v6  ;;  %v1148_v13 = vpack.c.bf16 %v1076_v8, %v1072_v61 }
 0x1d1   : > { %v1147_v14 = vpack.c.bf16 %v1075_v10, %v1071_v9  ;;  %v1149_v15 = vpack.c.bf16 %v1077_v11, %v1073_v3  ;;  %v754_v16 = vpop.f32.mrb[56].mxu0  ;;  %v947_v17 = vpop.f32.mrb[56].mxu1 }
 0x1d2   : > { %v755_v18 = vadd.f32 %v754_v16, %v3118_v25  ;;  %v948_v19 = vadd.f32 %v947_v17, %v3120_v26  ;;  %v756_v22 = vpop.f32.mrb[57].mxu0  ;;  %v949_v23 = vpop.f32.mrb[57].mxu1 }
 0x1d3   : > { %v757_v0 = vadd.f32 %v756_v22, %v3124_v27  ;;  %v950_v29 = vadd.f32 %v949_v23, %v3126_v28  ;;  %v758_v30 = vpop.f32.mrb[58].mxu0  ;;  %v951_v31 = vpop.f32.mrb[58].mxu1  ;;  %1716 = vmatprep.mubr.bf16.mxu1 %v1147_v14  ;;  %1909 = vmatprep.mubr.bf16.mxu0 %v1149_v15 }
 0x1d4   : > { %v1080_v32 = vmax.f32 %v948_v19, 0.0  ;;  %v759_v33 = vadd.f32 %v758_v30, %v3118_v25  ;;  %v952_v34 = vadd.f32 %v951_v31, %v3120_v26  ;;  %v760_v35 = vpop.f32.mrb[59].mxu0  ;;  %v953_v36 = vpop.f32.mrb[59].mxu1  ;;  %1717 = vmatmul.mubr.bf16.gmra.mrb[116].mxu1 %v1146_v12  ;;  %1910 = vmatmul.mubr.bf16.gmra.mrb[116].mxu0 %v1148_v13  ;;  %v1078_v40 = vmax.f32 %v755_v18, 0.0 }
 0x1d5   : > { %v1081_v37 = vmax.f32 %v950_v29, 0.0  ;;  %v761_v38 = vadd.f32 %v760_v35, %v3124_v27  ;;  %v954_v39 = vadd.f32 %v953_v36, %v3126_v28  ;;  %v1079_v43 = vmax.f32 %v757_v0, 0.0 }
 0x1d6   : > { %v1082_v41 = vmax.f32 %v759_v33, 0.0  ;;  %v1084_v42 = vmax.f32 %v952_v34, 0.0 }
 0x1d7   : > { %v1083_v44 = vmax.f32 %v761_v38, 0.0  ;;  %v1085_v45 = vmax.f32 %v954_v39, 0.0 }
 0x1d8   : > { %v1150_v46 = vpack.c.bf16 %v1082_v41, %v1078_v40  ;;  %v1152_v47 = vpack.c.bf16 %v1084_v42, %v1080_v32 }
 0x1d9   : > { %v1151_v48 = vpack.c.bf16 %v1083_v44, %v1079_v43  ;;  %v1153_v49 = vpack.c.bf16 %v1085_v45, %v1081_v37  ;;  %v764_v50 = vpop.f32.mrb[60].mxu0  ;;  %v957_v51 = vpop.f32.mrb[60].mxu1 }
 0x1da   : > { %v765_v52 = vadd.f32 %v764_v50, %v3118_v25  ;;  %v958_v53 = vadd.f32 %v957_v51, %v3120_v26  ;;  %v766_v54 = vpop.f32.mrb[61].mxu0  ;;  %v959_v55 = vpop.f32.mrb[61].mxu1 }
 0x1db   : > { %v767_v56 = vadd.f32 %v766_v54, %v3124_v27  ;;  %v960_v57 = vadd.f32 %v959_v55, %v3126_v28  ;;  %v768_v58 = vpop.f32.mrb[62].mxu0  ;;  %v961_v59 = vpop.f32.mrb[62].mxu1  ;;  %1726 = vmatprep.mubr.bf16.mxu1 %v1151_v48  ;;  %1919 = vmatprep.mubr.bf16.mxu0 %v1153_v49 }
 0x1dc   : > { %v1088_v60 = vmax.f32 %v958_v53, 0.0  ;;  %v769_v61 = vadd.f32 %v768_v58, %v3118_v25  ;;  %v962_v62 = vadd.f32 %v961_v59, %v3120_v26  ;;  %v770_v63 = vpop.f32.mrb[63].mxu0  ;;  %v963_v1 = vpop.f32.mrb[63].mxu1  ;;  %1727 = vmatmul.mubr.bf16.gmra.mrb[120].mxu1 %v1150_v46  ;;  %1920 = vmatmul.mubr.bf16.gmra.mrb[120].mxu0 %v1152_v47  ;;  %v1086_v5 = vmax.f32 %v765_v52, 0.0 }
 0x1dd   : > { %v1089_v2 = vmax.f32 %v960_v57, 0.0  ;;  %v771_v3 = vadd.f32 %v770_v63, %v3124_v27  ;;  %v964_v4 = vadd.f32 %v963_v1, %v3126_v28  ;;  %v1087_v8 = vmax.f32 %v767_v56, 0.0  ;;  %v1222_v27 = vld [vmem:[%s3458_s4] sm:$0x3] }
 0x1de   : > { %v1090_v6 = vmax.f32 %v769_v61, 0.0  ;;  %v1092_v7 = vmax.f32 %v962_v62, 0.0  ;;  %v3261_v28 = vrot.slane %v1222_v27, %v402_v21  ;;  %v3265_v13 = vrot.slane %v1222_v27, %v406_v24 }
 0x1df   : > { %v1091_v9 = vmax.f32 %v771_v3, 0.0  ;;  %v1093_v10 = vmax.f32 %v964_v4, 0.0 }
 0x1e0   : > { %v1154_v11 = vpack.c.bf16 %v1090_v6, %v1086_v5  ;;  %v1156_v25 = vpack.c.bf16 %v1092_v7, %v1088_v60 }
 0x1e1   : > { %v1155_v12 = vpack.c.bf16 %v1091_v9, %v1087_v8  ;;  %v1157_v26 = vpack.c.bf16 %v1093_v10, %v1089_v2 }
 0x1e3   : > { %1736 = vmatprep.mubr.bf16.mxu1 %v1155_v12  ;;  %1929 = vmatprep.mubr.bf16.mxu0 %v1157_v26 }
 0x1e4   : > { %1737 = vmatmul.mubr.bf16.gmra.mrb[124].mxu1 %v1154_v11  ;;  %1930 = vmatmul.mubr.bf16.gmra.mrb[124].mxu0 %v1156_v25 }
 0x23f   : > { %v1588_v14 = vpop.f32.mrb[64].mxu1  ;;  %v1781_v15 = vpop.f32.mrb[64].mxu0 }
 0x240   : > { %v1589_v16 = vadd.f32 %v1588_v14, %v3261_v28  ;;  %v1590_v17 = vpop.f32.mrb[65].mxu1  ;;  %v1783_v18 = vpop.f32.mrb[65].mxu0 }
 0x241   : > { %v1591_v19 = vadd.f32 %v1590_v17, %v3265_v13  ;;  %v1592_v22 = vpop.f32.mrb[66].mxu1  ;;  %v1785_v23 = vpop.f32.mrb[66].mxu0 }
 0x242   : > { %v1782_v0 = vadd.f32 %v1781_v15, %v1589_v16  ;;  %v1593_v29 = vadd.f32 %v1592_v22, %v3261_v28  ;;  %v1594_v21 = vpop.f32.mrb[67].mxu1  ;;  %v1787_v30 = vpop.f32.mrb[67].mxu0 }
 0x243   : > { %v1784_v31 = vadd.f32 %v1783_v18, %v1591_v19  ;;  %v1595_v20 = vadd.f32 %v1594_v21, %v3265_v13 }
 0x244   : > { %1940 = vst [vmem:[%s3272_s9] sm:$0xff] %v1782_v0  ;;  %v1786_v24 = vadd.f32 %v1785_v23, %v1593_v29 }
 0x245   : > { %1941 = vst [vmem:[%s3272_s9 + $0x8] sm:$0xff] %v1784_v31  ;;  %v1788_v32 = vadd.f32 %v1787_v30, %v1595_v20 }
 0x246   : > { %1942 = vst [vmem:[%s3272_s9 + $0x10] sm:$0xff] %v1786_v24 }
 0x247   : > { %1943 = vst [vmem:[%s3272_s9 + $0x18] sm:$0xff] %v1788_v32  ;;  %v1598_v33 = vpop.f32.mrb[68].mxu1  ;;  %v1791_v34 = vpop.f32.mrb[68].mxu0 }
 0x248   : > { %v1599_v35 = vadd.f32 %v1598_v33, %v3261_v28  ;;  %v1600_v36 = vpop.f32.mrb[69].mxu1  ;;  %v1793_v37 = vpop.f32.mrb[69].mxu0 }
 0x249   : > { %v1601_v38 = vadd.f32 %v1600_v36, %v3265_v13  ;;  %v1602_v39 = vpop.f32.mrb[70].mxu1  ;;  %v1795_v40 = vpop.f32.mrb[70].mxu0 }
 0x24a   : > { %v1792_v41 = vadd.f32 %v1791_v34, %v1599_v35  ;;  %v1603_v42 = vadd.f32 %v1602_v39, %v3261_v28  ;;  %v1604_v43 = vpop.f32.mrb[71].mxu1  ;;  %v1797_v44 = vpop.f32.mrb[71].mxu0 }
 0x24b   : > { %v1794_v45 = vadd.f32 %v1793_v37, %v1601_v38  ;;  %v1605_v46 = vadd.f32 %v1604_v43, %v3265_v13 }
 0x24c   : > { %1944 = vst [vmem:[%s3272_s9 + $0x20] sm:$0xff] %v1792_v41  ;;  %v1796_v47 = vadd.f32 %v1795_v40, %v1603_v42 }
 0x24d   : > { %1945 = vst [vmem:[%s3272_s9 + $0x28] sm:$0xff] %v1794_v45  ;;  %v1798_v48 = vadd.f32 %v1797_v44, %v1605_v46 }
 0x24e   : > { %1946 = vst [vmem:[%s3272_s9 + $0x30] sm:$0xff] %v1796_v47 }
 0x24f   : > { %1947 = vst [vmem:[%s3272_s9 + $0x38] sm:$0xff] %v1798_v48  ;;  %v1608_v49 = vpop.f32.mrb[72].mxu1  ;;  %v1801_v50 = vpop.f32.mrb[72].mxu0 }
 0x250   : > { %v1609_v51 = vadd.f32 %v1608_v49, %v3261_v28  ;;  %v1610_v52 = vpop.f32.mrb[73].mxu1  ;;  %v1803_v53 = vpop.f32.mrb[73].mxu0 }
 0x251   : > { %v1611_v54 = vadd.f32 %v1610_v52, %v3265_v13  ;;  %v1612_v55 = vpop.f32.mrb[74].mxu1  ;;  %v1805_v56 = vpop.f32.mrb[74].mxu0 }
 0x252   : > { %v1802_v57 = vadd.f32 %v1801_v50, %v1609_v51  ;;  %v1613_v58 = vadd.f32 %v1612_v55, %v3261_v28  ;;  %v1614_v59 = vpop.f32.mrb[75].mxu1  ;;  %v1807_v60 = vpop.f32.mrb[75].mxu0 }
 0x253   : > { %v1804_v61 = vadd.f32 %v1803_v53, %v1611_v54  ;;  %v1615_v62 = vadd.f32 %v1614_v59, %v3265_v13 }
 0x254   : > { %1948 = vst [vmem:[%s3272_s9 + $0x40] sm:$0xff] %v1802_v57  ;;  %v1806_v63 = vadd.f32 %v1805_v56, %v1613_v58 }
 0x255   : > { %1949 = vst [vmem:[%s3272_s9 + $0x48] sm:$0xff] %v1804_v61  ;;  %v1808_v1 = vadd.f32 %v1807_v60, %v1615_v62 }
 0x256   : > { %1950 = vst [vmem:[%s3272_s9 + $0x50] sm:$0xff] %v1806_v63 }
 0x257   : > { %1951 = vst [vmem:[%s3272_s9 + $0x58] sm:$0xff] %v1808_v1  ;;  %v1618_v2 = vpop.f32.mrb[76].mxu1  ;;  %v1811_v3 = vpop.f32.mrb[76].mxu0 }
 0x258   : > { %v1619_v4 = vadd.f32 %v1618_v2, %v3261_v28  ;;  %v1620_v5 = vpop.f32.mrb[77].mxu1  ;;  %v1813_v6 = vpop.f32.mrb[77].mxu0 }
 0x259   : > { %v1621_v7 = vadd.f32 %v1620_v5, %v3265_v13  ;;  %v1622_v8 = vpop.f32.mrb[78].mxu1  ;;  %v1815_v9 = vpop.f32.mrb[78].mxu0 }
 0x25a   : > { %v1812_v10 = vadd.f32 %v1811_v3, %v1619_v4  ;;  %v1623_v11 = vadd.f32 %v1622_v8, %v3261_v28  ;;  %v1624_v25 = vpop.f32.mrb[79].mxu1  ;;  %v1817_v12 = vpop.f32.mrb[79].mxu0 }
 0x25b   : > { %v1814_v26 = vadd.f32 %v1813_v6, %v1621_v7  ;;  %v1625_v27 = vadd.f32 %v1624_v25, %v3265_v13 }
 0x25c   : > { %1952 = vst [vmem:[%s3272_s9 + $0x60] sm:$0xff] %v1812_v10  ;;  %v1816_v14 = vadd.f32 %v1815_v9, %v1623_v11 }
 0x25d   : > { %1953 = vst [vmem:[%s3272_s9 + $0x68] sm:$0xff] %v1814_v26  ;;  %v1818_v15 = vadd.f32 %v1817_v12, %v1625_v27 }
 0x25e   : > { %1954 = vst [vmem:[%s3272_s9 + $0x70] sm:$0xff] %v1816_v14 }
 0x25f   : > { %1955 = vst [vmem:[%s3272_s9 + $0x78] sm:$0xff] %v1818_v15  ;;  %v1628_v16 = vpop.f32.mrb[80].mxu1  ;;  %v1821_v17 = vpop.f32.mrb[80].mxu0 }
 0x260   : > { %v1629_v18 = vadd.f32 %v1628_v16, %v3261_v28  ;;  %v1630_v19 = vpop.f32.mrb[81].mxu1  ;;  %v1823_v22 = vpop.f32.mrb[81].mxu0 }
 0x261   : > { %v1631_v23 = vadd.f32 %v1630_v19, %v3265_v13  ;;  %v1632_v0 = vpop.f32.mrb[82].mxu1  ;;  %v1825_v29 = vpop.f32.mrb[82].mxu0 }
 0x262   : > { %v1822_v21 = vadd.f32 %v1821_v17, %v1629_v18  ;;  %v1633_v30 = vadd.f32 %v1632_v0, %v3261_v28  ;;  %v1634_v31 = vpop.f32.mrb[83].mxu1  ;;  %v1827_v20 = vpop.f32.mrb[83].mxu0 }
 0x263   : > { %v1824_v24 = vadd.f32 %v1823_v22, %v1631_v23  ;;  %v1635_v32 = vadd.f32 %v1634_v31, %v3265_v13 }
 0x264   : > { %1956 = vst [vmem:[%s3272_s9 + $0x80] sm:$0xff] %v1822_v21  ;;  %v1826_v33 = vadd.f32 %v1825_v29, %v1633_v30 }
 0x265   : > { %1957 = vst [vmem:[%s3272_s9 + $0x88] sm:$0xff] %v1824_v24  ;;  %v1828_v34 = vadd.f32 %v1827_v20, %v1635_v32 }
 0x266   : > { %1958 = vst [vmem:[%s3272_s9 + $0x90] sm:$0xff] %v1826_v33 }
 0x267   : > { %1959 = vst [vmem:[%s3272_s9 + $0x98] sm:$0xff] %v1828_v34  ;;  %v1638_v35 = vpop.f32.mrb[84].mxu1  ;;  %v1831_v36 = vpop.f32.mrb[84].mxu0 }
 0x268   : > { %v1639_v37 = vadd.f32 %v1638_v35, %v3261_v28  ;;  %v1640_v38 = vpop.f32.mrb[85].mxu1  ;;  %v1833_v39 = vpop.f32.mrb[85].mxu0 }
 0x269   : > { %v1641_v40 = vadd.f32 %v1640_v38, %v3265_v13  ;;  %v1642_v41 = vpop.f32.mrb[86].mxu1  ;;  %v1835_v42 = vpop.f32.mrb[86].mxu0 }
 0x26a   : > { %v1832_v43 = vadd.f32 %v1831_v36, %v1639_v37  ;;  %v1643_v44 = vadd.f32 %v1642_v41, %v3261_v28  ;;  %v1644_v45 = vpop.f32.mrb[87].mxu1  ;;  %v1837_v46 = vpop.f32.mrb[87].mxu0 }
 0x26b   : > { %v1834_v47 = vadd.f32 %v1833_v39, %v1641_v40  ;;  %v1645_v48 = vadd.f32 %v1644_v45, %v3265_v13 }
 0x26c   : > { %1960 = vst [vmem:[%s3272_s9 + $0xa0] sm:$0xff] %v1832_v43  ;;  %v1836_v49 = vadd.f32 %v1835_v42, %v1643_v44 }
 0x26d   : > { %1961 = vst [vmem:[%s3272_s9 + $0xa8] sm:$0xff] %v1834_v47  ;;  %v1838_v50 = vadd.f32 %v1837_v46, %v1645_v48 }
 0x26e   : > { %1962 = vst [vmem:[%s3272_s9 + $0xb0] sm:$0xff] %v1836_v49 }
 0x26f   : > { %1963 = vst [vmem:[%s3272_s9 + $0xb8] sm:$0xff] %v1838_v50  ;;  %v1648_v51 = vpop.f32.mrb[88].mxu1  ;;  %v1841_v52 = vpop.f32.mrb[88].mxu0 }
 0x270   : > { %v1649_v53 = vadd.f32 %v1648_v51, %v3261_v28  ;;  %v1650_v54 = vpop.f32.mrb[89].mxu1  ;;  %v1843_v55 = vpop.f32.mrb[89].mxu0 }
 0x271   : > { %v1651_v56 = vadd.f32 %v1650_v54, %v3265_v13  ;;  %v1652_v57 = vpop.f32.mrb[90].mxu1  ;;  %v1845_v58 = vpop.f32.mrb[90].mxu0 }
 0x272   : > { %v1842_v59 = vadd.f32 %v1841_v52, %v1649_v53  ;;  %v1653_v60 = vadd.f32 %v1652_v57, %v3261_v28  ;;  %v1654_v61 = vpop.f32.mrb[91].mxu1  ;;  %v1847_v62 = vpop.f32.mrb[91].mxu0 }
 0x273   : > { %v1844_v63 = vadd.f32 %v1843_v55, %v1651_v56  ;;  %v1655_v1 = vadd.f32 %v1654_v61, %v3265_v13 }
 0x274   : > { %1964 = vst [vmem:[%s3272_s9 + $0xc0] sm:$0xff] %v1842_v59  ;;  %v1846_v2 = vadd.f32 %v1845_v58, %v1653_v60 }
 0x275   : > { %1965 = vst [vmem:[%s3272_s9 + $0xc8] sm:$0xff] %v1844_v63  ;;  %v1848_v3 = vadd.f32 %v1847_v62, %v1655_v1 }
 0x276   : > { %1966 = vst [vmem:[%s3272_s9 + $0xd0] sm:$0xff] %v1846_v2 }
 0x277   : > { %1967 = vst [vmem:[%s3272_s9 + $0xd8] sm:$0xff] %v1848_v3  ;;  %v1658_v4 = vpop.f32.mrb[92].mxu1  ;;  %v1851_v5 = vpop.f32.mrb[92].mxu0 }
 0x278   : > { %v1659_v6 = vadd.f32 %v1658_v4, %v3261_v28  ;;  %v1660_v7 = vpop.f32.mrb[93].mxu1  ;;  %v1853_v8 = vpop.f32.mrb[93].mxu0 }
 0x279   : > { %v1661_v9 = vadd.f32 %v1660_v7, %v3265_v13  ;;  %v1662_v10 = vpop.f32.mrb[94].mxu1  ;;  %v1855_v11 = vpop.f32.mrb[94].mxu0 }
 0x27a   : > { %v1852_v25 = vadd.f32 %v1851_v5, %v1659_v6  ;;  %v1663_v12 = vadd.f32 %v1662_v10, %v3261_v28  ;;  %v1664_v26 = vpop.f32.mrb[95].mxu1  ;;  %v1857_v27 = vpop.f32.mrb[95].mxu0 }
 0x27b   : > { %v1854_v14 = vadd.f32 %v1853_v8, %v1661_v9  ;;  %v1665_v15 = vadd.f32 %v1664_v26, %v3265_v13 }
 0x27c   : > { %1968 = vst [vmem:[%s3272_s9 + $0xe0] sm:$0xff] %v1852_v25  ;;  %v1856_v16 = vadd.f32 %v1855_v11, %v1663_v12 }
 0x27d   : > { %1969 = vst [vmem:[%s3272_s9 + $0xe8] sm:$0xff] %v1854_v14  ;;  %v1858_v17 = vadd.f32 %v1857_v27, %v1665_v15 }
 0x27e   : > { %1970 = vst [vmem:[%s3272_s9 + $0xf0] sm:$0xff] %v1856_v16 }
 0x27f   : > { %1971 = vst [vmem:[%s3272_s9 + $0xf8] sm:$0xff] %v1858_v17  ;;  %v1668_v18 = vpop.f32.mrb[96].mxu1  ;;  %v1861_v19 = vpop.f32.mrb[96].mxu0 }
 0x280   : > { %v1669_v22 = vadd.f32 %v1668_v18, %v3261_v28  ;;  %v1670_v23 = vpop.f32.mrb[97].mxu1  ;;  %v1863_v0 = vpop.f32.mrb[97].mxu0 }
 0x281   : > { %v1671_v29 = vadd.f32 %v1670_v23, %v3265_v13  ;;  %v1672_v21 = vpop.f32.mrb[98].mxu1  ;;  %v1865_v30 = vpop.f32.mrb[98].mxu0 }
 0x282   : > { %v1862_v31 = vadd.f32 %v1861_v19, %v1669_v22  ;;  %v1673_v20 = vadd.f32 %v1672_v21, %v3261_v28  ;;  %v1674_v24 = vpop.f32.mrb[99].mxu1  ;;  %v1867_v32 = vpop.f32.mrb[99].mxu0 }
 0x283   : > { %v1864_v33 = vadd.f32 %v1863_v0, %v1671_v29  ;;  %v1675_v34 = vadd.f32 %v1674_v24, %v3265_v13 }
 0x284   : > { %1972 = vst [vmem:[%s3272_s9 + $0x100] sm:$0xff] %v1862_v31  ;;  %v1866_v35 = vadd.f32 %v1865_v30, %v1673_v20 }
 0x285   : > { %1973 = vst [vmem:[%s3272_s9 + $0x108] sm:$0xff] %v1864_v33  ;;  %v1868_v36 = vadd.f32 %v1867_v32, %v1675_v34 }
 0x286   : > { %1974 = vst [vmem:[%s3272_s9 + $0x110] sm:$0xff] %v1866_v35 }
 0x287   : > { %1975 = vst [vmem:[%s3272_s9 + $0x118] sm:$0xff] %v1868_v36  ;;  %v1678_v37 = vpop.f32.mrb[100].mxu1  ;;  %v1871_v38 = vpop.f32.mrb[100].mxu0 }
 0x288   : > { %v1679_v39 = vadd.f32 %v1678_v37, %v3261_v28  ;;  %v1680_v40 = vpop.f32.mrb[101].mxu1  ;;  %v1873_v41 = vpop.f32.mrb[101].mxu0 }
 0x289   : > { %v1681_v42 = vadd.f32 %v1680_v40, %v3265_v13  ;;  %v1682_v43 = vpop.f32.mrb[102].mxu1  ;;  %v1875_v44 = vpop.f32.mrb[102].mxu0 }
 0x28a   : > { %v1872_v45 = vadd.f32 %v1871_v38, %v1679_v39  ;;  %v1683_v46 = vadd.f32 %v1682_v43, %v3261_v28  ;;  %v1684_v47 = vpop.f32.mrb[103].mxu1  ;;  %v1877_v48 = vpop.f32.mrb[103].mxu0 }
 0x28b   : > { %v1874_v49 = vadd.f32 %v1873_v41, %v1681_v42  ;;  %v1685_v50 = vadd.f32 %v1684_v47, %v3265_v13 }
 0x28c   : > { %1976 = vst [vmem:[%s3272_s9 + $0x120] sm:$0xff] %v1872_v45  ;;  %v1876_v51 = vadd.f32 %v1875_v44, %v1683_v46 }
 0x28d   : > { %1977 = vst [vmem:[%s3272_s9 + $0x128] sm:$0xff] %v1874_v49  ;;  %v1878_v52 = vadd.f32 %v1877_v48, %v1685_v50 }
 0x28e   : > { %1978 = vst [vmem:[%s3272_s9 + $0x130] sm:$0xff] %v1876_v51 }
 0x28f   : > { %1979 = vst [vmem:[%s3272_s9 + $0x138] sm:$0xff] %v1878_v52  ;;  %v1688_v53 = vpop.f32.mrb[104].mxu1  ;;  %v1881_v54 = vpop.f32.mrb[104].mxu0 }
 0x290   : > { %v1689_v55 = vadd.f32 %v1688_v53, %v3261_v28  ;;  %v1690_v56 = vpop.f32.mrb[105].mxu1  ;;  %v1883_v57 = vpop.f32.mrb[105].mxu0 }
 0x291   : > { %v1691_v58 = vadd.f32 %v1690_v56, %v3265_v13  ;;  %v1692_v59 = vpop.f32.mrb[106].mxu1  ;;  %v1885_v60 = vpop.f32.mrb[106].mxu0 }
 0x292   : > { %v1882_v61 = vadd.f32 %v1881_v54, %v1689_v55  ;;  %v1693_v62 = vadd.f32 %v1692_v59, %v3261_v28  ;;  %v1694_v63 = vpop.f32.mrb[107].mxu1  ;;  %v1887_v1 = vpop.f32.mrb[107].mxu0 }
 0x293   : > { %v1884_v2 = vadd.f32 %v1883_v57, %v1691_v58  ;;  %v1695_v3 = vadd.f32 %v1694_v63, %v3265_v13 }
 0x294   : > { %1980 = vst [vmem:[%s3272_s9 + $0x140] sm:$0xff] %v1882_v61  ;;  %v1886_v4 = vadd.f32 %v1885_v60, %v1693_v62 }
 0x295   : > { %1981 = vst [vmem:[%s3272_s9 + $0x148] sm:$0xff] %v1884_v2  ;;  %v1888_v5 = vadd.f32 %v1887_v1, %v1695_v3 }
 0x296   : > { %1982 = vst [vmem:[%s3272_s9 + $0x150] sm:$0xff] %v1886_v4 }
 0x297   : > { %1983 = vst [vmem:[%s3272_s9 + $0x158] sm:$0xff] %v1888_v5  ;;  %v1698_v6 = vpop.f32.mrb[108].mxu1  ;;  %v1891_v7 = vpop.f32.mrb[108].mxu0 }
 0x298   : > { %v1699_v8 = vadd.f32 %v1698_v6, %v3261_v28  ;;  %v1700_v9 = vpop.f32.mrb[109].mxu1  ;;  %v1893_v10 = vpop.f32.mrb[109].mxu0 }
 0x299   : > { %v1701_v11 = vadd.f32 %v1700_v9, %v3265_v13  ;;  %v1702_v25 = vpop.f32.mrb[110].mxu1  ;;  %v1895_v12 = vpop.f32.mrb[110].mxu0 }
 0x29a   : > { %v1892_v26 = vadd.f32 %v1891_v7, %v1699_v8  ;;  %v1703_v27 = vadd.f32 %v1702_v25, %v3261_v28  ;;  %v1704_v14 = vpop.f32.mrb[111].mxu1  ;;  %v1897_v15 = vpop.f32.mrb[111].mxu0 }
 0x29b   : > { %v1894_v16 = vadd.f32 %v1893_v10, %v1701_v11  ;;  %v1705_v17 = vadd.f32 %v1704_v14, %v3265_v13 }
 0x29c   : > { %1984 = vst [vmem:[%s3272_s9 + $0x160] sm:$0xff] %v1892_v26  ;;  %v1896_v18 = vadd.f32 %v1895_v12, %v1703_v27 }
 0x29d   : > { %1985 = vst [vmem:[%s3272_s9 + $0x168] sm:$0xff] %v1894_v16  ;;  %v1898_v19 = vadd.f32 %v1897_v15, %v1705_v17 }
 0x29e   : > { %1986 = vst [vmem:[%s3272_s9 + $0x170] sm:$0xff] %v1896_v18 }
 0x29f   : > { %1987 = vst [vmem:[%s3272_s9 + $0x178] sm:$0xff] %v1898_v19  ;;  %v1708_v22 = vpop.f32.mrb[112].mxu1  ;;  %v1901_v23 = vpop.f32.mrb[112].mxu0 }
 0x2a0   : > { %v1709_v0 = vadd.f32 %v1708_v22, %v3261_v28  ;;  %v1710_v29 = vpop.f32.mrb[113].mxu1  ;;  %v1903_v21 = vpop.f32.mrb[113].mxu0 }
 0x2a1   : > { %v1711_v30 = vadd.f32 %v1710_v29, %v3265_v13  ;;  %v1712_v31 = vpop.f32.mrb[114].mxu1  ;;  %v1905_v20 = vpop.f32.mrb[114].mxu0 }
 0x2a2   : > { %v1902_v24 = vadd.f32 %v1901_v23, %v1709_v0  ;;  %v1713_v32 = vadd.f32 %v1712_v31, %v3261_v28  ;;  %v1714_v33 = vpop.f32.mrb[115].mxu1  ;;  %v1907_v34 = vpop.f32.mrb[115].mxu0 }
 0x2a3   : > { %v1904_v35 = vadd.f32 %v1903_v21, %v1711_v30  ;;  %v1715_v36 = vadd.f32 %v1714_v33, %v3265_v13 }
 0x2a4   : > { %1988 = vst [vmem:[%s3272_s9 + $0x180] sm:$0xff] %v1902_v24  ;;  %v1906_v37 = vadd.f32 %v1905_v20, %v1713_v32 }
 0x2a5   : > { %1989 = vst [vmem:[%s3272_s9 + $0x188] sm:$0xff] %v1904_v35  ;;  %v1908_v38 = vadd.f32 %v1907_v34, %v1715_v36 }
 0x2a6   : > { %1990 = vst [vmem:[%s3272_s9 + $0x190] sm:$0xff] %v1906_v37 }
 0x2a7   : > { %1991 = vst [vmem:[%s3272_s9 + $0x198] sm:$0xff] %v1908_v38  ;;  %v1718_v39 = vpop.f32.mrb[116].mxu1  ;;  %v1911_v40 = vpop.f32.mrb[116].mxu0 }
 0x2a8   : > { %v1719_v41 = vadd.f32 %v1718_v39, %v3261_v28  ;;  %v1720_v42 = vpop.f32.mrb[117].mxu1  ;;  %v1913_v43 = vpop.f32.mrb[117].mxu0 }
 0x2a9   : > { %v1721_v44 = vadd.f32 %v1720_v42, %v3265_v13  ;;  %v1722_v45 = vpop.f32.mrb[118].mxu1  ;;  %v1915_v46 = vpop.f32.mrb[118].mxu0 }
 0x2aa   : > { %v1912_v47 = vadd.f32 %v1911_v40, %v1719_v41  ;;  %v1723_v48 = vadd.f32 %v1722_v45, %v3261_v28  ;;  %v1724_v49 = vpop.f32.mrb[119].mxu1  ;;  %v1917_v50 = vpop.f32.mrb[119].mxu0 }
 0x2ab   : > { %v1914_v51 = vadd.f32 %v1913_v43, %v1721_v44  ;;  %v1725_v52 = vadd.f32 %v1724_v49, %v3265_v13 }
 0x2ac   : > { %1992 = vst [vmem:[%s3272_s9 + $0x1a0] sm:$0xff] %v1912_v47  ;;  %v1916_v53 = vadd.f32 %v1915_v46, %v1723_v48 }
 0x2ad   : > { %1993 = vst [vmem:[%s3272_s9 + $0x1a8] sm:$0xff] %v1914_v51  ;;  %v1918_v54 = vadd.f32 %v1917_v50, %v1725_v52 }
 0x2ae   : > { %1994 = vst [vmem:[%s3272_s9 + $0x1b0] sm:$0xff] %v1916_v53 }
 0x2af   : > { %1995 = vst [vmem:[%s3272_s9 + $0x1b8] sm:$0xff] %v1918_v54  ;;  %v1728_v55 = vpop.f32.mrb[120].mxu1  ;;  %v1921_v56 = vpop.f32.mrb[120].mxu0 }
 0x2b0   : > { %v1729_v57 = vadd.f32 %v1728_v55, %v3261_v28  ;;  %v1730_v58 = vpop.f32.mrb[121].mxu1  ;;  %v1923_v59 = vpop.f32.mrb[121].mxu0 }
 0x2b1   : > { %v1731_v60 = vadd.f32 %v1730_v58, %v3265_v13  ;;  %v1732_v61 = vpop.f32.mrb[122].mxu1  ;;  %v1925_v62 = vpop.f32.mrb[122].mxu0 }
 0x2b2   : > { %v1922_v63 = vadd.f32 %v1921_v56, %v1729_v57  ;;  %v1733_v1 = vadd.f32 %v1732_v61, %v3261_v28  ;;  %v1734_v2 = vpop.f32.mrb[123].mxu1  ;;  %v1927_v3 = vpop.f32.mrb[123].mxu0 }
 0x2b3   : > { %v1924_v4 = vadd.f32 %v1923_v59, %v1731_v60  ;;  %v1735_v5 = vadd.f32 %v1734_v2, %v3265_v13 }
 0x2b4   : > { %1996 = vst [vmem:[%s3272_s9 + $0x1c0] sm:$0xff] %v1922_v63  ;;  %v1926_v6 = vadd.f32 %v1925_v62, %v1733_v1 }
 0x2b5   : > { %1997 = vst [vmem:[%s3272_s9 + $0x1c8] sm:$0xff] %v1924_v4  ;;  %v1928_v7 = vadd.f32 %v1927_v3, %v1735_v5 }
 0x2b6   : > { %1998 = vst [vmem:[%s3272_s9 + $0x1d0] sm:$0xff] %v1926_v6 }
 0x2b7   : > { %1999 = vst [vmem:[%s3272_s9 + $0x1d8] sm:$0xff] %v1928_v7  ;;  %v1738_v8 = vpop.f32.mrb[124].mxu1  ;;  %v1931_v9 = vpop.f32.mrb[124].mxu0 }
 0x2b8   : > { %v1739_v10 = vadd.f32 %v1738_v8, %v3261_v28  ;;  %v1740_v11 = vpop.f32.mrb[125].mxu1  ;;  %v1933_v25 = vpop.f32.mrb[125].mxu0 }
 0x2b9   : > { %v1741_v12 = vadd.f32 %v1740_v11, %v3265_v13  ;;  %v1742_v26 = vpop.f32.mrb[126].mxu1  ;;  %v1935_v27 = vpop.f32.mrb[126].mxu0 }
 0x2ba   : > { %v1932_v14 = vadd.f32 %v1931_v9, %v1739_v10  ;;  %v1743_v15 = vadd.f32 %v1742_v26, %v3261_v28  ;;  %v1744_v16 = vpop.f32.mrb[127].mxu1  ;;  %v1937_v17 = vpop.f32.mrb[127].mxu0 }
 0x2bb   : > { %v1934_v18 = vadd.f32 %v1933_v25, %v1741_v12  ;;  %v1745_v19 = vadd.f32 %v1744_v16, %v3265_v13 }
 0x2bc   : > { %2000 = vst [vmem:[%s3272_s9 + $0x1e0] sm:$0xff] %v1932_v14  ;;  %v1936_v22 = vadd.f32 %v1935_v27, %v1743_v15 }
 0x2bd   : > { %2001 = vst [vmem:[%s3272_s9 + $0x1e8] sm:$0xff] %v1934_v18  ;;  %v1938_v28 = vadd.f32 %v1937_v17, %v1745_v19 }
 0x2be   : > { %2002 = vst [vmem:[%s3272_s9 + $0x1f0] sm:$0xff] %v1936_v22 }
 0x2bf   : > { %2003 = vst [vmem:[%s3272_s9 + $0x1f8] sm:$0xff] %v1938_v28 }
 0x2c0   : > { %2719 = shalt.err (!%p2716_p11)
}
 0x2c1   : > { %s2720_s28 = scalar_lea.hbm %s3400_s14, 8192  ;;  %s2724_s6 = scalar_lea.hbm %s3459_s5, 16384 }
 0x2c2   : > { %p2721_p0 = scmp.ne.s32.totalorder %s3400_s14, %s2720_s28  ;;  %p2725_p6 = scmp.lt.u32.totalorder %s3400_s14, %s3459_s5 }
 0x2c3   : > { %p2726_p7 = scmp.lt.u32.totalorder %s2724_s6, %s2720_s28  ;;  %p2728_p8 = scmp.lt.u32.totalorder %s2720_s28, %s3400_s14 }
 0x2c4   : > { %p2722_p4 = pnand %p2721_p0, %p3476_p12 }
 0x2c5   : > { %p2727_p2 = por %p2726_p7, %p2725_p6 }
 0x2c6   : > { %p2723_p13 = pneg %p2722_p4 }
 0x2c7   : > { %p2729_p1 = por %p2728_p8, %p2727_p2 }
 0x2c9   : > { %p2730_p10 = pnand %p2729_p1, %p2723_p13 }
 0x2cb   : > { %2733 = shalt.err (!%p2730_p10)
}
 0x2cc   : > { %s2803_s16 = smov 256   ;;  %s2804_s7 = smov 16  }
 0x2cd   : > { %2396 = dma.vmem_to_hbm [thread:$0]  (%p3476_p12), %s3402_s13, 8192, %s3400_s14, %s2005_s21, %s2803_s16, %s2803_s16, %s2804_s7  }
 0x2ce PF: > { %s2036_s27 = sand.u32 1, %s2772_s18   ;;  %p3477_p3 = scmp.ne.s32.totalorder %s3468_s29, 0 }
 0x2cf   : > { %p3478_p5 = scmp.ge.s32.totalorder %s2792_s23, 2  ;;  %s2037_s15 = scalar_lea.sflag [#allocation4], %s2036_s27 }
 0x2d1   : > { %p2410_p9 = pnand %p3478_p5, %p3477_p3 }
 0x2d3   : > { %2767 = dma.done.wait (!%p2410_p9), %s2037_s15, 8192  }
 0x2d4   : > { %2769 = vsyncadd (!%p2410_p9), %s2037_s15, 4294959104  ;;  %s22_s23 = sadd.s32 1, %s2792_s23   ;;  %s3479_s18 = smov %s2776_s19 }
 0x2d5   : > { %p19_p11 = scmp.ge.s32.totalorder %s22_s23, 4   ;;  %s3480_s19 = smov %s2780_s20 }
 0x2d6   : > { %s3481_s20 = smov %s2980_s17  ;;  %s3482_s21 = smov %s2788_s22 }
 0x2d7   : > { %s3483_s22 = smov %s3485_s12  ;;  %21 = sbr.rel (!%p19_p11) target bundleno = 7 (0x7), region = 97 }
 0x2de   :  { %2042 = vsyncpa [#allocation3], 1 }
 0x2df   :  { %2044 = vsyncpa [#allocation3 + $0x1], 1 }
 0x2e0   :  { %2045 = vsyncpa [#allocation6], 1 }
 0x2e1   :  { %2046 = vsyncpa [#allocation4], 1 }
 0x2e2   :  { %2048 = vsyncpa [#allocation4 + $0x1], 1 }

</bundles_post_ra>
